<compile_context>
chip_gen: v7x
topology: tpu7x:2x2x1
jax: 0.10.0
libtpu: 0.0.40
codegen_flags: <defaults>
</compile_context>

<pallas_src>
import functools
import math

import jax
import jax.numpy as jnp
from jax.experimental import pallas as pl
from jax.experimental.pallas import tpu as pltpu

_NEG_INF = -9e15


def _round_up(x, m):
    return (x + m - 1) // m * m


def _leaky_relu(x):
    # 2 VPU ops (mul + max) instead of 3 (cmp + mul + select).
    return jnp.maximum(x, 0.01 * x)


# --------------------------------------------------------------------------
# Kernel 1: projections (run once per row block of nodes, O(N*Din*F))
# --------------------------------------------------------------------------
def _proj_kernel(hctx_ref, hstr_ref, wc_ref, bc_ref, ws_ref, bs_ref,
                 ac1_ref, as1_ref, ac2_ref, as2_ref,
                 hc_out_ref, s1_ref, t1_ref, s2_ref, t2_ref):
    # context projection
    hc = jnp.dot(hctx_ref[...], wc_ref[...],
                 preferred_element_type=jnp.float32) + bc_ref[...]

    # feature-axis softmax of h_structure, then structure projection
    x = hstr_ref[...]
    m = jnp.max(x, axis=1, keepdims=True)
    e = jnp.exp(x - m)
    sm = e / jnp.sum(e, axis=1, keepdims=True)       # O(N*Din): exact is free
    hs = jnp.dot(sm, ws_ref[...],
                 preferred_element_type=jnp.float32) + bs_ref[...]

    # |Ws_coff| / |Wc_coff| are pre-folded into ac*/as* in the wrapper
    # (leaky_relu is positively homogeneous), so kernel 2 has no scalar muls.
    s1_ref[...] = jnp.dot(hc, ac1_ref[...], preferred_element_type=jnp.float32)
    t1_ref[...] = jnp.dot(hs, as1_ref[...], preferred_element_type=jnp.float32)

    # "neighbor" halves produced directly as [1, T] row vectors via a
    # dot_general contracting the feature axis -> no transposes anywhere near
    # the O(N^2) inner loop.
    dn = (((1,), (1,)), ((), ()))
    s2_ref[...] = jax.lax.dot_general(ac2_ref[...], hc, dimension_numbers=dn,
                                      preferred_element_type=jnp.float32)
    t2_ref[...] = jax.lax.dot_general(as2_ref[...], hs, dimension_numbers=dn,
                                      preferred_element_type=jnp.float32)

    # bf16 copy of hc for the MXU aggregate in kernel 2
    hc_out_ref[...] = hc.astype(hc_out_ref.dtype)


# --------------------------------------------------------------------------
# Kernel 2: flash-style masked online-softmax + aggregation over column blocks
# --------------------------------------------------------------------------
def _attn_kernel(s1_ref, t1_ref, s2_ref, t2_ref, adj_ref, hc_ref,
                 out_ref, m_sc, l_sc, acc_sc,
                 *, tile_c, hc_resident, exp_dtype):
    j = pl.program_id(1)

    @pl.when(j == 0)
    def _init():
        m_sc[...] = jnp.full(m_sc.shape, -jnp.inf, m_sc.dtype)
        l_sc[...] = jnp.zeros(l_sc.shape, l_sc.dtype)
        acc_sc[...] = jnp.zeros(acc_sc.shape, acc_sc.dtype)

    # coefficient-pre-scaled outer-sum logits: [TR,1] + [1,TC] -> [TR,TC]
    alpha = (_leaky_relu(s1_ref[...] + s2_ref[...])
             + _leaky_relu(t1_ref[...] + t2_ref[...]))

    # int8 edge mask (value precision irrelevant; 1 byte / entry HBM stream)
    logits = jnp.where(adj_ref[...] > 0, alpha, _NEG_INF)

    # online softmax update (statistics stay f32)
    m_prev = m_sc[...]
    m_new = jnp.maximum(m_prev, jnp.max(logits, axis=1, keepdims=True))
    corr = jnp.exp(m_prev - m_new)
    p = jnp.exp((logits - m_new).astype(exp_dtype))   # bf16 EUP on v6e/v7x
    l_sc[...] = corr * l_sc[...] + jnp.sum(p.astype(jnp.float32),
                                           axis=1, keepdims=True)

    if hc_resident:
        start = pl.multiple_of(j * tile_c, tile_c)
        hc_blk = hc_ref[pl.ds(start, tile_c), :]
    else:
        hc_blk = hc_ref[...]
    acc_sc[...] = corr * acc_sc[...] + jnp.dot(
        p.astype(jnp.bfloat16), hc_blk, preferred_element_type=jnp.float32)
    m_sc[...] = m_new

    @pl.when(j == pl.num_programs(1) - 1)
    def _finalize():
        # exact normalization: only O(N*F), tightens accuracy for free
        out_ref[...] = (acc_sc[...] / l_sc[...]).astype(out_ref.dtype)


# --------------------------------------------------------------------------
# Tile / padding selection
# --------------------------------------------------------------------------
def _choose_tiles(N, tile_r, tile_c):
    if tile_r is not None or tile_c is not None:
        tr = int(tile_r) if tile_r is not None else 128
        tc = int(tile_c) if tile_c is not None else 128
        assert tr % 128 == 0 and tc % 128 == 0
        np_ = _round_up(N, math.lcm(tr, tc))
        return np_, tr, tc

    np_ = _round_up(max(N, 1), 128)
    if np_ >= 1024:
        # pad a bit further so wide column tiles divide evenly (bigger DMAs,
        # fewer grid steps in the O(N^2) loop)
        np_ = _round_up(N, 512)
    tr = 256 if np_ % 256 == 0 else 128
    tc = 128
    for cand in (1024, 512, 256):
        if np_ % cand == 0:
            tc = cand
            break
    return np_, tr, tc


# --------------------------------------------------------------------------
# Wrapper
# --------------------------------------------------------------------------
def mix_attention(h_context, h_structure, adj,
                  wc, bc, ws, bs, a_context, a_structure, ws_coff, wc_coff,
                  *, tile_r=None, tile_c=None, exp_dtype=None):
    N, Din = h_context.shape
    Fout = wc.shape[1]
    Fp = _round_up(Fout, 128)                 # lane-dense feature dim

    Np, tr, tc = _choose_tiles(N, tile_r, tile_c)
    n_row1 = Np // tr

    f32, bf16 = jnp.float32, jnp.bfloat16

    if exp_dtype is None:
        kind = jax.devices()[0].device_kind.lower()
        # bf16 EUP exists on v6e / v7x only; keep f32 elsewhere (v5e & older).
        exp_dtype = bf16 if ("v6" in kind or "v7" in kind) else f32

    # --- cheap wrapper-side prep (pad only when actually needed) -----------
    hctx_p = h_context.astype(f32)
    hstr_p = h_structure.astype(f32)
    adj_mask = (adj > 0).astype(jnp.int8)     # 1-byte edge mask, fused w/ pad
    if Np != N:
        hctx_p = jnp.zeros((Np, Din), f32).at[:N].set(hctx_p)
        hstr_p = jnp.zeros((Np, Din), f32).at[:N].set(hstr_p)
        adj_mask = jnp.zeros((Np, Np), jnp.int8).at[:N, :N].set(adj_mask)

    wc_p = jnp.zeros((Din, Fp), f32).at[:, :Fout].set(wc.astype(f32))
    ws_p = jnp.zeros((Din, Fp), f32).at[:, :Fout].set(ws.astype(f32))
    bc_p = jnp.zeros((1, Fp), f32).at[0, :Fout].set(bc.astype(f32))
    bs_p = jnp.zeros((1, Fp), f32).at[0, :Fout].set(bs.astype(f32))

    # fold |coeff| into the attention vectors (leaky_relu(c*x) = c*leaky_relu(x)
    # for c >= 0), so kernel 2 has no per-element coefficient work.
    aws = jnp.abs(ws_coff[0, 0]).astype(f32)  # scales the context branch
    awc = jnp.abs(wc_coff[0, 0]).astype(f32)  # scales the structure branch
    ac = a_context.astype(f32)
    a_s = a_structure.astype(f32)
    ac1 = jnp.zeros((Fp, 1), f32).at[:Fout, 0].set(aws * ac[:Fout])
    ac2 = jnp.zeros((1, Fp), f32).at[0, :Fout].set(aws * ac[Fout:])
    as1 = jnp.zeros((Fp, 1), f32).at[:Fout, 0].set(awc * a_s[:Fout])
    as2 = jnp.zeros((1, Fp), f32).at[0, :Fout].set(awc * a_s[Fout:])

    vmem_limit = 32 * 1024 * 1024             # safe on v7x (64 MiB physical)

    full = lambda i: (0, 0)
    rowb = lambda i: (i, 0)
    colb = lambda i: (0, i)

    # ---- kernel 1: projections -------------------------------------------
    hc, s1, t1, s2, t2 = pl.pallas_call(
        _proj_kernel,
        out_shape=(jax.ShapeDtypeStruct((Np, Fp), bf16),
                   jax.ShapeDtypeStruct((Np, 1), f32),
                   jax.ShapeDtypeStruct((Np, 1), f32),
                   jax.ShapeDtypeStruct((1, Np), f32),
                   jax.ShapeDtypeStruct((1, Np), f32)),
        grid=(n_row1,),
        in_specs=[pl.BlockSpec((tr, Din), rowb),
                  pl.BlockSpec((tr, Din), rowb),
                  pl.BlockSpec((Din, Fp), full),
                  pl.BlockSpec((1, Fp), full),
                  pl.BlockSpec((Din, Fp), full),
                  pl.BlockSpec((1, Fp), full),
                  pl.BlockSpec((Fp, 1), full),
                  pl.BlockSpec((Fp, 1), full),
                  pl.BlockSpec((1, Fp), full),
                  pl.BlockSpec((1, Fp), full)],
        out_specs=(pl.BlockSpec((tr, Fp), rowb),
                   pl.BlockSpec((tr, 1), rowb),
                   pl.BlockSpec((tr, 1), rowb),
                   pl.BlockSpec((1, tr), colb),
                   pl.BlockSpec((1, tr), colb)),
        compiler_params=pltpu.CompilerParams(
            dimension_semantics=("parallel",),
            vmem_limit_bytes=vmem_limit),
    )(hctx_p, hstr_p, wc_p, bc_p, ws_p, bs_p, ac1, as1, ac2, as2)

    # ---- kernel 2: masked online-softmax + aggregate ----------------------
    # Hold hc VMEM-resident when it fits (removes the per-row-block re-stream
    # of hc, ~33% of kernel-2 HBM bytes); budget assumes 2 pipeline buffers.
    hc_resident = 2 * Np * Fp * 2 <= 16 * 1024 * 1024
    if hc_resident:
        hc_spec = pl.BlockSpec((Np, Fp), lambda i, j: (0, 0))
    else:
        hc_spec = pl.BlockSpec((tc, Fp), lambda i, j: (j, 0))

    kernel2 = functools.partial(_attn_kernel, tile_c=tc,
                                hc_resident=hc_resident, exp_dtype=exp_dtype)

    out_p = pl.pallas_call(
        kernel2,
        out_shape=jax.ShapeDtypeStruct((Np, Fp), f32),
        grid=(Np // tr, Np // tc),
        in_specs=[pl.BlockSpec((tr, 1), lambda i, j: (i, 0)),
                  pl.BlockSpec((tr, 1), lambda i, j: (i, 0)),
                  pl.BlockSpec((1, tc), lambda i, j: (0, j)),
                  pl.BlockSpec((1, tc), lambda i, j: (0, j)),
                  pl.BlockSpec((tr, tc), lambda i, j: (i, j)),
                  hc_spec],
        out_specs=pl.BlockSpec((tr, Fp), lambda i, j: (i, 0)),
        scratch_shapes=[pltpu.VMEM((tr, 1), f32),
                        pltpu.VMEM((tr, 1), f32),
                        pltpu.VMEM((tr, Fp), f32)],
        compiler_params=pltpu.CompilerParams(
            dimension_semantics=("parallel", "arbitrary"),
            vmem_limit_bytes=vmem_limit),
    )(s1, t1, s2, t2, adj_mask, hc)

    return out_p[:N, :Fout]


# --------------------------------------------------------------------------
# Pure-JAX reference + deterministic test harness
# --------------------------------------------------------------------------
def _reference(h_context, h_structure, adj,
               wc, bc, ws, bs, a_context, a_structure, ws_coff, wc_coff):
    Fout = wc.shape[1]
    hc = h_context @ wc + bc
    s1 = hc @ a_context[:Fout]
    s2 = hc @ a_context[Fout:]
    ca = jax.nn.leaky_relu(s1[:, None] + s2[None, :], negative_slope=0.01)
    hs = jax.nn.softmax(h_structure, axis=1) @ ws + bs
    t1 = hs @ a_structure[:Fout]
    t2 = hs @ a_structure[Fout:]
    sa = jax.nn.leaky_relu(t1[:, None] + t2[None, :], negative_slope=0.01)
    alpha = jnp.abs(ws_coff[0, 0]) * ca + jnp.abs(wc_coff[0, 0]) * sa
    att = jnp.where(adj > 0, alpha, _NEG_INF)
    att = jax.nn.softmax(att, axis=1)
    return att @ hc


def _glorot_uniform(key, shape, gain=1.0):
    fan_in, fan_out = shape[0], shape[1]
    limit = gain * jnp.sqrt(6.0 / (fan_in + fan_out))
    return jax.random.uniform(key, shape, jnp.float32, -limit, limit)


def _make_inputs(key, N, Din, Fout):
    keys = jax.random.split(key, 9)
    h_context = jax.random.normal(keys[0], (N, Din), jnp.float32)
    h_structure = jax.random.normal(keys[1], (N, Din), jnp.float32)
    adj = ((jax.random.uniform(keys[2], (N, N)) > 0.5) | jnp.eye(N, dtype=bool)
           ).astype(jnp.float32)
    wc = _glorot_uniform(keys[3], (Din, Fout))
    bc = jnp.zeros((Fout,), jnp.float32)
    ws = _glorot_uniform(keys[4], (Din, Fout))
    bs = jnp.zeros((Fout,), jnp.float32)
    a_context = _glorot_uniform(keys[5], (2 * Fout, 1)).reshape(2 * Fout)
    a_structure = _glorot_uniform(keys[6], (2 * Fout, 1)).reshape(2 * Fout)
    ws_coff = _glorot_uniform(keys[7], (1, 1), gain=1.414)
    wc_coff = _glorot_uniform(keys[8], (1, 1), gain=1.414)
    return (h_context, h_structure, adj, wc, bc, ws, bs,
            a_context, a_structure, ws_coff, wc_coff)


if __name__ == "__main__":
    key = jax.random.PRNGKey(0)
    k1, k2, k3 = jax.random.split(key, 3)

    # bf16 MXU operands (+ bf16 exp on v6e/v7x) -> compare loosely against the
    # pure-f32 XLA reference.
    tol = dict(atol=5e-2, rtol=5e-2)

    # Case 1: multi-tile path (N=160 padded to 256, 128x128 tiles -> grid (2,2)),
    # exercising the online softmax across column blocks and row padding.
    args = _make_inputs(k1, 160, 16, 32)
    out = jax.block_until_ready(mix_attention(*args, tile_r=128, tile_c=128))
    ref = _reference(*args)
    assert out.shape == ref.shape
    assert jnp.allclose(out, ref, **tol), "mismatch vs reference (N=160)"

    # Case 2: tiny graph with heavy padding, single-tile grid, default tiles.
    args = _make_inputs(k2, 8, 16, 32)
    out = jax.block_until_ready(mix_attention(*args))
    ref = _reference(*args)
    assert out.shape == ref.shape
    assert jnp.allclose(out, ref, **tol), "mismatch vs reference (N=8)"

    # Case 3: asymmetric tiles (128x256 -> N=300 padded to 512, grid (4,2)),
    # exercising the VMEM-resident hc dynamic slice across column blocks.
    args = _make_inputs(k3, 300, 16, 32)
    out = jax.block_until_ready(mix_attention(*args, tile_r=128, tile_c=256))
    ref = _reference(*args)
    assert out.shape == ref.shape
    assert jnp.allclose(out, ref, **tol), "mismatch vs reference (N=300)"

    print("KERNEL_OK")
</pallas_src>

<mosaic_0001>
module attributes {stable_mosaic.version = 11 : i64} {
  func.func @_proj_kernel(%arg0: i32, %arg1: memref<128x16xf32, #tpu.memory_space<vmem>>, %arg2: memref<128x16xf32, #tpu.memory_space<vmem>>, %arg3: memref<16x128xf32, #tpu.memory_space<vmem>>, %arg4: memref<1x128xf32, #tpu.memory_space<vmem>>, %arg5: memref<16x128xf32, #tpu.memory_space<vmem>>, %arg6: memref<1x128xf32, #tpu.memory_space<vmem>>, %arg7: memref<128x1xf32, #tpu.memory_space<vmem>>, %arg8: memref<128x1xf32, #tpu.memory_space<vmem>>, %arg9: memref<1x128xf32, #tpu.memory_space<vmem>>, %arg10: memref<1x128xf32, #tpu.memory_space<vmem>>, %arg11: memref<128x128xbf16, #tpu.memory_space<vmem>>, %arg12: memref<128x1xf32, #tpu.memory_space<vmem>>, %arg13: memref<128x1xf32, #tpu.memory_space<vmem>>, %arg14: memref<1x128xf32, #tpu.memory_space<vmem>>, %arg15: memref<1x128xf32, #tpu.memory_space<vmem>>) attributes {dimension_semantics = [#tpu.dimension_semantics<parallel>], iteration_bounds = array<i64: 2>, scalar_prefetch = 0 : i64, scratch_operands = 0 : i64, tpu.core_type = #tpu.core_type<tc>, window_params = [{transform_indices = @transform_0, window_bounds = array<i64: 128, 16>}, {transform_indices = @transform_1, window_bounds = array<i64: 128, 16>}, {pipeline_mode = #tpu.pipeline_mode<synchronous>, transform_indices = @transform_2, window_bounds = array<i64: 16, 128>}, {pipeline_mode = #tpu.pipeline_mode<synchronous>, transform_indices = @transform_3, window_bounds = array<i64: 1, 128>}, {pipeline_mode = #tpu.pipeline_mode<synchronous>, transform_indices = @transform_4, window_bounds = array<i64: 16, 128>}, {pipeline_mode = #tpu.pipeline_mode<synchronous>, transform_indices = @transform_5, window_bounds = array<i64: 1, 128>}, {pipeline_mode = #tpu.pipeline_mode<synchronous>, transform_indices = @transform_6, window_bounds = array<i64: 128, 1>}, {pipeline_mode = #tpu.pipeline_mode<synchronous>, transform_indices = @transform_7, window_bounds = array<i64: 128, 1>}, {pipeline_mode = #tpu.pipeline_mode<synchronous>, transform_indices = @transform_8, window_bounds = array<i64: 1, 128>}, {pipeline_mode = #tpu.pipeline_mode<synchronous>, transform_indices = @transform_9, window_bounds = array<i64: 1, 128>}, {transform_indices = @transform_10, window_bounds = array<i64: 128, 128>}, {transform_indices = @transform_11, window_bounds = array<i64: 128, 1>}, {transform_indices = @transform_12, window_bounds = array<i64: 128, 1>}, {transform_indices = @transform_13, window_bounds = array<i64: 1, 128>}, {transform_indices = @transform_14, window_bounds = array<i64: 1, 128>}]} {
    %c0 = arith.constant 0 : index
    %c0_0 = arith.constant 0 : index
    %0 = vector.load %arg1[%c0, %c0_0] : memref<128x16xf32, #tpu.memory_space<vmem>>, vector<128x16xf32>
    %c0_1 = arith.constant 0 : index
    %c0_2 = arith.constant 0 : index
    %1 = vector.load %arg3[%c0_1, %c0_2] : memref<16x128xf32, #tpu.memory_space<vmem>>, vector<16x128xf32>
    %cst = arith.constant dense<0.000000e+00> : vector<128x128xf32>
    %2 = tpu.matmul %0, %1, %cst {dimension_numbers = #tpu.dot_dimension_numbers<[1], [0], [0], [1], [0, 0, 1, 1], [], []>} : vector<128x16xf32>, vector<16x128xf32>, vector<128x128xf32> -> vector<128x128xf32>
    %c0_3 = arith.constant 0 : index
    %c0_4 = arith.constant 0 : index
    %3 = vector.load %arg4[%c0_3, %c0_4] : memref<1x128xf32, #tpu.memory_space<vmem>>, vector<1x128xf32>
    %4 = vector.broadcast %3 : vector<1x128xf32> to vector<128x128xf32>
    %5 = arith.addf %2, %4 : vector<128x128xf32>
    %c0_5 = arith.constant 0 : index
    %c0_6 = arith.constant 0 : index
    %6 = vector.load %arg2[%c0_5, %c0_6] : memref<128x16xf32, #tpu.memory_space<vmem>>, vector<128x16xf32>
    %cst_7 = arith.constant dense<0xFF800000> : vector<128xf32>
    %7 = vector.multi_reduction <maximumf>, %6, %cst_7 [1] : vector<128x16xf32> to vector<128xf32>
    %8 = vector.shape_cast %7 : vector<128xf32> to vector<128x1xf32>
    %9 = vector.broadcast %8 : vector<128x1xf32> to vector<128x16xf32>
    %10 = arith.subf %6, %9 : vector<128x16xf32>
    %11 = math.exp %10 : vector<128x16xf32>
    %cst_8 = arith.constant dense<0.000000e+00> : vector<128xf32>
    %12 = vector.multi_reduction <add>, %11, %cst_8 [1] : vector<128x16xf32> to vector<128xf32>
    %13 = vector.shape_cast %12 : vector<128xf32> to vector<128x1xf32>
    %14 = vector.broadcast %13 : vector<128x1xf32> to vector<128x16xf32>
    %15 = arith.divf %11, %14 : vector<128x16xf32>
    %c0_9 = arith.constant 0 : index
    %c0_10 = arith.constant 0 : index
    %16 = vector.load %arg5[%c0_9, %c0_10] : memref<16x128xf32, #tpu.memory_space<vmem>>, vector<16x128xf32>
    %cst_11 = arith.constant dense<0.000000e+00> : vector<128x128xf32>
    %17 = tpu.matmul %15, %16, %cst_11 {dimension_numbers = #tpu.dot_dimension_numbers<[1], [0], [0], [1], [0, 0, 1, 1], [], []>} : vector<128x16xf32>, vector<16x128xf32>, vector<128x128xf32> -> vector<128x128xf32>
    %c0_12 = arith.constant 0 : index
    %c0_13 = arith.constant 0 : index
    %18 = vector.load %arg6[%c0_12, %c0_13] : memref<1x128xf32, #tpu.memory_space<vmem>>, vector<1x128xf32>
    %19 = vector.broadcast %18 : vector<1x128xf32> to vector<128x128xf32>
    %20 = arith.addf %17, %19 : vector<128x128xf32>
    %c0_14 = arith.constant 0 : index
    %c0_15 = arith.constant 0 : index
    %21 = vector.load %arg7[%c0_14, %c0_15] : memref<128x1xf32, #tpu.memory_space<vmem>>, vector<128x1xf32>
    %cst_16 = arith.constant dense<0.000000e+00> : vector<128x1xf32>
    %22 = tpu.matmul %5, %21, %cst_16 {dimension_numbers = #tpu.dot_dimension_numbers<[1], [0], [0], [1], [0, 0, 1, 1], [], []>} : vector<128x128xf32>, vector<128x1xf32>, vector<128x1xf32> -> vector<128x1xf32>
    %c0_17 = arith.constant 0 : index
    %c0_18 = arith.constant 0 : index
    %23 = vector.load %arg12[%c0_17, %c0_18] : memref<128x1xf32, #tpu.memory_space<vmem>>, vector<128x1xf32>
    tpu.vector_store %arg12[%c0_17, %c0_18], %22 {strides = array<i32>} : memref<128x1xf32, #tpu.memory_space<vmem>>, vector<128x1xf32>,
    %c0_19 = arith.constant 0 : index
    %c0_20 = arith.constant 0 : index
    %24 = vector.load %arg8[%c0_19, %c0_20] : memref<128x1xf32, #tpu.memory_space<vmem>>, vector<128x1xf32>
    %cst_21 = arith.constant dense<0.000000e+00> : vector<128x1xf32>
    %25 = tpu.matmul %20, %24, %cst_21 {dimension_numbers = #tpu.dot_dimension_numbers<[1], [0], [0], [1], [0, 0, 1, 1], [], []>} : vector<128x128xf32>, vector<128x1xf32>, vector<128x1xf32> -> vector<128x1xf32>
    %c0_22 = arith.constant 0 : index
    %c0_23 = arith.constant 0 : index
    %26 = vector.load %arg13[%c0_22, %c0_23] : memref<128x1xf32, #tpu.memory_space<vmem>>, vector<128x1xf32>
    tpu.vector_store %arg13[%c0_22, %c0_23], %25 {strides = array<i32>} : memref<128x1xf32, #tpu.memory_space<vmem>>, vector<128x1xf32>,
    %c0_24 = arith.constant 0 : index
    %c0_25 = arith.constant 0 : index
    %27 = vector.load %arg9[%c0_24, %c0_25] : memref<1x128xf32, #tpu.memory_space<vmem>>, vector<1x128xf32>
    %cst_26 = arith.constant dense<0.000000e+00> : vector<1x128xf32>
    %28 = tpu.matmul %27, %5, %cst_26 {dimension_numbers = #tpu.dot_dimension_numbers<[1], [1], [0], [0], [0, 0, 1, 0], [], []>} : vector<1x128xf32>, vector<128x128xf32>, vector<1x128xf32> -> vector<1x128xf32>
    %c0_27 = arith.constant 0 : index
    %c0_28 = arith.constant 0 : index
    %29 = vector.load %arg14[%c0_27, %c0_28] : memref<1x128xf32, #tpu.memory_space<vmem>>, vector<1x128xf32>
    tpu.vector_store %arg14[%c0_27, %c0_28], %28 {strides = array<i32>} : memref<1x128xf32, #tpu.memory_space<vmem>>, vector<1x128xf32>,
    %c0_29 = arith.constant 0 : index
    %c0_30 = arith.constant 0 : index
    %30 = vector.load %arg10[%c0_29, %c0_30] : memref<1x128xf32, #tpu.memory_space<vmem>>, vector<1x128xf32>
    %cst_31 = arith.constant dense<0.000000e+00> : vector<1x128xf32>
    %31 = tpu.matmul %30, %20, %cst_31 {dimension_numbers = #tpu.dot_dimension_numbers<[1], [1], [0], [0], [0, 0, 1, 0], [], []>} : vector<1x128xf32>, vector<128x128xf32>, vector<1x128xf32> -> vector<1x128xf32>
    %c0_32 = arith.constant 0 : index
    %c0_33 = arith.constant 0 : index
    %32 = vector.load %arg15[%c0_32, %c0_33] : memref<1x128xf32, #tpu.memory_space<vmem>>, vector<1x128xf32>
    tpu.vector_store %arg15[%c0_32, %c0_33], %31 {strides = array<i32>} : memref<1x128xf32, #tpu.memory_space<vmem>>, vector<1x128xf32>,
    %33 = arith.truncf %5 : vector<128x128xf32> to vector<128x128xbf16>
    %c0_34 = arith.constant 0 : index
    %c0_35 = arith.constant 0 : index
    %34 = vector.load %arg11[%c0_34, %c0_35] : memref<128x128xbf16, #tpu.memory_space<vmem>>, vector<128x128xbf16>
    tpu.vector_store %arg11[%c0_34, %c0_35], %33 {strides = array<i32>} : memref<128x128xbf16, #tpu.memory_space<vmem>>, vector<128x128xbf16>,
    return
  }
  func.func @transform_0(%arg0: i32) -> (i32, i32) {
    %c0_i32 = arith.constant 0 : i32
    %c0_i32_0 = arith.constant 0 : i32
    return %arg0, %c0_i32 : i32, i32
  }
  func.func @transform_1(%arg0: i32) -> (i32, i32) {
    %c0_i32 = arith.constant 0 : i32
    %c0_i32_0 = arith.constant 0 : i32
    return %arg0, %c0_i32 : i32, i32
  }
  func.func @transform_2(%arg0: i32) -> (i32, i32) {
    %c0_i32 = arith.constant 0 : i32
    %c0_i32_0 = arith.constant 0 : i32
    %c0_i32_1 = arith.constant 0 : i32
    return %c0_i32, %c0_i32_0 : i32, i32
  }
  func.func @transform_3(%arg0: i32) -> (i32, i32) {
    %c0_i32 = arith.constant 0 : i32
    %c0_i32_0 = arith.constant 0 : i32
    %c0_i32_1 = arith.constant 0 : i32
    return %c0_i32, %c0_i32_0 : i32, i32
  }
  func.func @transform_4(%arg0: i32) -> (i32, i32) {
    %c0_i32 = arith.constant 0 : i32
    %c0_i32_0 = arith.constant 0 : i32
    %c0_i32_1 = arith.constant 0 : i32
    return %c0_i32, %c0_i32_0 : i32, i32
  }
  func.func @transform_5(%arg0: i32) -> (i32, i32) {
    %c0_i32 = arith.constant 0 : i32
    %c0_i32_0 = arith.constant 0 : i32
    %c0_i32_1 = arith.constant 0 : i32
    return %c0_i32, %c0_i32_0 : i32, i32
  }
  func.func @transform_6(%arg0: i32) -> (i32, i32) {
    %c0_i32 = arith.constant 0 : i32
    %c0_i32_0 = arith.constant 0 : i32
    %c0_i32_1 = arith.constant 0 : i32
    return %c0_i32, %c0_i32_0 : i32, i32
  }
  func.func @transform_7(%arg0: i32) -> (i32, i32) {
    %c0_i32 = arith.constant 0 : i32
    %c0_i32_0 = arith.constant 0 : i32
    %c0_i32_1 = arith.constant 0 : i32
    return %c0_i32, %c0_i32_0 : i32, i32
  }
  func.func @transform_8(%arg0: i32) -> (i32, i32) {
    %c0_i32 = arith.constant 0 : i32
    %c0_i32_0 = arith.constant 0 : i32
    %c0_i32_1 = arith.constant 0 : i32
    return %c0_i32, %c0_i32_0 : i32, i32
  }
  func.func @transform_9(%arg0: i32) -> (i32, i32) {
    %c0_i32 = arith.constant 0 : i32
    %c0_i32_0 = arith.constant 0 : i32
    %c0_i32_1 = arith.constant 0 : i32
    return %c0_i32, %c0_i32_0 : i32, i32
  }
  func.func @transform_10(%arg0: i32) -> (i32, i32) {
    %c0_i32 = arith.constant 0 : i32
    %c0_i32_0 = arith.constant 0 : i32
    return %arg0, %c0_i32 : i32, i32
  }
  func.func @transform_11(%arg0: i32) -> (i32, i32) {
    %c0_i32 = arith.constant 0 : i32
    %c0_i32_0 = arith.constant 0 : i32
    return %arg0, %c0_i32 : i32, i32
  }
  func.func @transform_12(%arg0: i32) -> (i32, i32) {
    %c0_i32 = arith.constant 0 : i32
    %c0_i32_0 = arith.constant 0 : i32
    return %arg0, %c0_i32 : i32, i32
  }
  func.func @transform_13(%arg0: i32) -> (i32, i32) {
    %c0_i32 = arith.constant 0 : i32
    %c0_i32_0 = arith.constant 0 : i32
    return %c0_i32, %arg0 : i32, i32
  }
  func.func @transform_14(%arg0: i32) -> (i32, i32) {
    %c0_i32 = arith.constant 0 : i32
    %c0_i32_0 = arith.constant 0 : i32
    return %c0_i32, %arg0 : i32, i32
  }
}

</mosaic_0001>

<bundles_post_ra>
// kernel: tpu_custom_call.1
= control target key start
LH: loop header
LB: loop body
LE: loop exit
PB: predicated region body
PF: predicated region fallthrough
CT: control target
= control target key end

     0   :  { %s3542_s0 = inlined_call_operand.vmem [shape: f32[256,16], index: 0, kind: input, shape index: {}]   ;;  %s3543_s1 = inlined_call_operand.vmem [shape: f32[256,16], index: 1, kind: input, shape index: {}]   ;;  %s3544_s2 = inlined_call_operand.vmem [shape: f32[16,128], index: 2, kind: input, shape index: {}]   ;;  %s3545_s3 = inlined_call_operand.vmem [shape: f32[1,128], index: 3, kind: input, shape index: {}]   ;;  %s3546_s4 = inlined_call_operand.vmem [shape: f32[16,128], index: 4, kind: input, shape index: {}]   ;;  %s3547_s5 = inlined_call_operand.vmem [shape: f32[1,128], index: 5, kind: input, shape index: {}]   ;;  %s3548_s6 = inlined_call_operand.vmem [shape: f32[128,1], index: 6, kind: input, shape index: {}]   ;;  %s3549_s7 = inlined_call_operand.vmem [shape: f32[128,1], index: 7, kind: input, shape index: {}]   ;;  %s3550_s8 = inlined_call_operand.vmem [shape: f32[1,128], index: 8, kind: input, shape index: {}]   ;;  %s3551_s9 = inlined_call_operand.vmem [shape: f32[1,128], index: 9, kind: input, shape index: {}]   ;;  %s3552_s10 = inlined_call_operand.hbm [shape: bf16[256,128], index: 10, kind: output, shape index: {0}]   ;;  %s3553_s11 = inlined_call_operand.vmem [shape: f32[256,1], index: 11, kind: output, shape index: {1}]   ;;  %s3554_s12 = inlined_call_operand.vmem [shape: f32[256,1], index: 12, kind: output, shape index: {2}]   ;;  %s3555_s13 = inlined_call_operand.hbm [shape: f32[1,256], index: 13, kind: output, shape index: {3}]   ;;  %s3556_s14 = inlined_call_operand.hbm [shape: f32[1,256], index: 14, kind: output, shape index: {4}]  }
   0x1   :  { %3559 = sst [smem:[#allocation11_spill]] %s3542_s0 }
   0x2   :  { %3560 = sst [smem:[#allocation12_spill]] %s3543_s1 }
   0x3   :  { %3561 = sst [smem:[#allocation13_spill]] %s3544_s2 }
   0x4   :  { %3562 = sst [smem:[#allocation14_spill]] %s3545_s3 }
   0x5   :  { %3563 = sst [smem:[#allocation15_spill]] %s3546_s4 }
   0x6   :  { %3564 = sst [smem:[#allocation16_spill]] %s3547_s5 }
   0x7   :  { %3565 = sst [smem:[#allocation17_spill]] %s3548_s6 }
   0x8   :  { %3566 = sst [smem:[#allocation18_spill]] %s3549_s7 }
   0x9   :  { %20 = vsyncpa [#allocation3], 0 }
   0xa   :  { %22 = vsyncpa [#allocation3 + $0x1], 0 }
   0xb   :  { %23 = vsyncpa [#allocation5], 0 }
   0xc   :  { %25 = vsyncpa [#allocation5 + $0x1], 0  ;;  %s2919_s29 = smov 0   ;;  %s2921_s30 = smov 0  }
   0xd   :  { %s2923_s15 = smov 0   ;;  %s2925_s16 = smov 0  }
   0xe LB: > { %3567 = sst [smem:[#allocation9_spill]] %s2830_s15  ;;  %s2940_s17 = sadd.s32 4294967295, %s2834_s16   ;;  %s2834_s16 = sphi %s2925_s16, %s3584_s16   ;;  %s2830_s15 = sphi %s2923_s15, %s3581_s15   ;;  %s2826_s30 = sphi %s2921_s30, %s3583_s30   ;;  %s2822_s29 = sphi %s2919_s29, %s3582_s29  }
   0xf   : > { %s3557_s18 = sadd.s32 4294967294, %s2834_s16   ;;  %s2944_s19 = sadd.s32 1, %s2834_s16  }
  0x10   : > { %s258_s20 = sadd.s32 1, %s2830_s15  ;;  %s255_s21 = ssub.s32 %s2834_s16, %s2944_s19 }
  0x11   : > { %p268_p0 = scmp.ne.s32.totalorder %s2830_s15, %s2826_s30  ;;  %p256_p1 = scmp.eq.s32.totalorder %s255_s21, 0 }
  0x12   : > { %p269_p2 = scmp.eq.s32.totalorder %s2940_s17, 1  ;;  %p274_p3 = scmp.ne.s32.totalorder %s2826_s30, %s2822_s29 }
  0x13   : > { %p275_p4 = scmp.eq.s32.totalorder %s3557_s18, 1  ;;  %p1971_p7 = scmp.ge.s32.totalorder %s2834_s16, 1 }
  0x14   : > { %s2957_s22 = scalar_select %p256_p1, %s2830_s15, %s258_s20  }
  0x15   : > { %p2959_p5 = por %p269_p2, %p268_p0  ;;  %p2963_p6 = por %p275_p4, %p274_p3 }
  0x16   : > { %3568 = sst [smem:[#allocation10_spill]] %s2957_s22  ;;  %p439_p8 = scmp.lt.s32.totalorder %s2834_s16, 3 }
  0x18   : > { %p440_p9 = pnand %p1971_p7, %p439_p8 }
  0x19   : > { %s2970_s25 = sshll.u32 (!%p440_p9), %s2940_s17, 4  ;;  %vm558_vm0 = vcmask (!%p440_p9), 130048   ;;  %s3571_s1 = sld [smem:[#allocation12_spill]] (!%p440_p9)  ;;  %vm2837_vm1 = vmmov (!%p440_p9), 0   ;;  %vm1307_vm2 = vcmask (!%p440_p9), 7168  }
  0x1a   : > { %443 = sbr.rel (%p440_p9) target bundleno = 862 (0x35e), region = 60  ;;  %p509_p10 = scmp.lt.s32.totalorder (!%p440_p9), %s2970_s25, 31 }
  0x1b   : > { %s3572_s2 = sld [smem:[#allocation13_spill]] (!%p440_p9)  ;;  %s3573_s0 = sld [smem:[#allocation11_spill]] (!%p440_p9) }
  0x1c   : > { %s3574_s4 = sld [smem:[#allocation15_spill]] (!%p440_p9)  ;;  %s3575_s6 = sld [smem:[#allocation17_spill]] (!%p440_p9) }
  0x1d   : > { %s3576_s7 = sld [smem:[#allocation18_spill]] (!%p440_p9)  ;;  %s3577_s3 = sld [smem:[#allocation14_spill]] (!%p440_p9) }
  0x1e   : > { %s3578_s5 = sld [smem:[#allocation16_spill]] (!%p440_p9)  ;;  %s1740_s15 = sand.u32 (!%p440_p9), 1, %s2940_s17  }
  0x21   : > { %s510_s26 = scalar_select %p509_p10, %s2970_s25, 31 }
  0x23   : > { %s2974_s27 = sshll.u32 %s510_s26, 3 }
  0x24   : > { %s2980_s21 = scalar_lea.vmem %s3571_s1, %s2974_s27  ;;  %s3112_s18 = scalar_lea.vmem %s3573_s0, %s2974_s27 }
  0x25   : > { %v752_v0 = vld [vmem:[%s2980_s21] sm:$0xff]  ;;  %v754_v1 = vld [vmem:[%s2980_s21 + $0x10] sm:$0xff]  ;;  %v753_v2 = vld [vmem:[%s2980_s21 + $0x8] sm:$0xff]  ;;  %s3293_s1 = sand.u32 1, %s2826_s30  }
  0x26   : > { %v768_v3 = vsel %vm558_vm0, %v752_v0, -inf  ;;  %v774_v4 = vsel %vm558_vm0, %v754_v1, -inf  ;;  %v755_v5 = vld [vmem:[%s2980_s21 + $0x18] sm:$0xff]  ;;  %v771_v6 = vsel %vm558_vm0, %v753_v2, -inf  ;;  %v756_v8 = vld [vmem:[%s2980_s21 + $0x20] sm:$0xff]  ;;  %v757_v9 = vld [vmem:[%s2980_s21 + $0x28] sm:$0xff] }
  0x27   : > { %769 = vmax.xlane.f32.xlu0 %v768_v3  ;;  %775 = vmax.xlane.f32.xlu1 %v774_v4  ;;  %v777_v7 = vsel %vm558_vm0, %v755_v5, -inf  ;;  %v780_v10 = vsel %vm558_vm0, %v756_v8, -inf  ;;  %v783_v11 = vsel %vm558_vm0, %v757_v9, -inf  ;;  %v758_v12 = vld [vmem:[%s2980_s21 + $0x30] sm:$0xff]  ;;  %v759_v13 = vld [vmem:[%s2980_s21 + $0x38] sm:$0xff]  ;;  %v2999_v16 = vld [vmem:[%s2980_s21 + $0x40] sm:$0xff] }
  0x28   : > { %v786_v14 = vsel %vm558_vm0, %v758_v12, -inf  ;;  %v789_v15 = vsel %vm558_vm0, %v759_v13, -inf  ;;  %v3002_v17 = vld [vmem:[%s2980_s21 + $0x48] sm:$0xff]  ;;  %v792_v18 = vsel %vm558_vm0, %v2999_v16, -inf  ;;  %v3009_v20 = vld [vmem:[%s2980_s21 + $0x50] sm:$0xff]  ;;  %v3012_v21 = vld [vmem:[%s2980_s21 + $0x58] sm:$0xff] }
  0x29   : > { %v795_v19 = vsel %vm558_vm0, %v3002_v17, -inf  ;;  %v798_v22 = vsel %vm558_vm0, %v3009_v20, -inf  ;;  %v801_v23 = vsel %vm558_vm0, %v3012_v21, -inf  ;;  %v3019_v24 = vld [vmem:[%s2980_s21 + $0x60] sm:$0xff]  ;;  %v3022_v25 = vld [vmem:[%s2980_s21 + $0x68] sm:$0xff]  ;;  %v3029_v28 = vld [vmem:[%s2980_s21 + $0x70] sm:$0xff] }
  0x2a   : > { %v804_v26 = vsel %vm558_vm0, %v3019_v24, -inf  ;;  %v807_v27 = vsel %vm558_vm0, %v3022_v25, -inf  ;;  %v3032_v29 = vld [vmem:[%s2980_s21 + $0x78] sm:$0xff]  ;;  %v810_v30 = vsel %vm558_vm0, %v3029_v28, -inf  ;;  %s1972_s28 = sshll.u32 %s3293_s1, 6  ;;  %s501_s0 = scalar_lea.vmem [#allocation4], %s3293_s1 }
  0x2b   : > { %772 = vmax.xlane.f32.xlu0 %v771_v6  ;;  %778 = vmax.xlane.f32.xlu1 %v777_v7  ;;  %v813_v31 = vsel %vm558_vm0, %v3032_v29, -inf  ;;  %s1779_s21 = scalar_lea.hbm %s3555_s13, %s2970_s25 }
  0x2f   : > { %781 = vmax.xlane.f32.xlu0 %v780_v10  ;;  %784 = vmax.xlane.f32.xlu1 %v783_v11 }
  0x33   : > { %787 = vmax.xlane.f32.xlu0 %v786_v14  ;;  %790 = vmax.xlane.f32.xlu1 %v789_v15 }
  0x37   : > { %793 = vmax.xlane.f32.xlu0 %v792_v18  ;;  %796 = vmax.xlane.f32.xlu1 %v795_v19 }
  0x3b   : > { %799 = vmax.xlane.f32.xlu0 %v798_v22  ;;  %802 = vmax.xlane.f32.xlu1 %v801_v23 }
  0x3f   : > { %805 = vmax.xlane.f32.xlu0 %v804_v26  ;;  %808 = vmax.xlane.f32.xlu1 %v807_v27 }
  0x43   : > { %811 = vmax.xlane.f32.xlu0 %v810_v30  ;;  %814 = vmax.xlane.f32.xlu1 %v813_v31 }
  0xb4   : > { %v770_v32 = vpop.xlane.xlu0 %769  ;;  %v776_v33 = vpop.xlane.xlu1 %775 }
  0xb5   : > { %v816_v34 = vsub.f32 %v752_v0, %v770_v32  ;;  %v818_v35 = vsub.f32 %v754_v1, %v776_v33 }
  0xb7   : > { %v832_v36 = vmul.f32 1.442695, %v816_v34  ;;  %v836_v37 = vmul.f32 1.442695, %v818_v35 }
  0xb8   : > { %v773_v38 = vpop.xlane.xlu0 %772  ;;  %v779_v39 = vpop.xlane.xlu1 %778 }
  0xb9   : > { %2648 = vpow2.f32 %v832_v36  ;;  %v817_v40 = vsub.f32 %v753_v2, %v773_v38  ;;  %v819_v41 = vsub.f32 %v755_v5, %v779_v39 }
  0xba   : > { %2650 = vpow2.f32 %v836_v37 }
  0xbb   : > { %v834_v42 = vmul.f32 1.442695, %v817_v40  ;;  %v838_v43 = vmul.f32 1.442695, %v819_v41  ;;  %v549_v40 = vld [vmem:[%s3572_s2] sm:$0xff]  ;;  %v550_v41 = vld [vmem:[%s3572_s2 + $0x8] sm:$0xff] }
  0xbc   : > { %v782_v44 = vpop.xlane.xlu0 %781  ;;  %v785_v45 = vpop.xlane.xlu1 %784  ;;  %s3402_s2 = scalar_lea.sflag [#allocation5], %s1740_s15 }
  0xbd   : > { %2652 = vpow2.f32 %v834_v42  ;;  %v820_v46 = vsub.f32 %v756_v8, %v782_v44  ;;  %v821_v47 = vsub.f32 %v757_v9, %v785_v45 }
  0xbe   : > { %2654 = vpow2.f32 %v838_v43  ;;  %v2474_v43 = vpack.c.bf16 %v550_v41, %v549_v40  ;;  %v1159_v40 = vld [vmem:[%s3575_s6 + $0x68] sm:$0xff] }
  0xbf   : > { %v840_v48 = vmul.f32 1.442695, %v820_v46  ;;  %v842_v49 = vmul.f32 1.442695, %v821_v47  ;;  %v944_v47 = vld [vmem:[%s3574_s4] sm:$0xff] }
  0xc0   : > { %v788_v50 = vpop.xlane.xlu0 %787  ;;  %v791_v51 = vpop.xlane.xlu1 %790  ;;  %2475 = vmatprep.subr.bf16.mxu0 %v2474_v43 }
  0xc1   : > { %2656 = vpow2.f32 %v840_v48  ;;  %v822_v52 = vsub.f32 %v758_v12, %v788_v50  ;;  %v823_v53 = vsub.f32 %v759_v13, %v791_v51  ;;  %v945_v48 = vld [vmem:[%s3574_s4 + $0x8] sm:$0xff]  ;;  %2477 = vmatpush3.bf16.msra.mxu0 %v2474_v43  ;;  %v533_v50 = vld [vmem:[%s3112_s18] sm:$0xff]  ;;  %v1160_v43 = vld [vmem:[%s3575_s6 + $0x70] sm:$0xff]  ;;  %s1781_s4 = sshll.u32 %s501_s0, 4  ;;  %s3395_s4 = int_to_ptr.vmem [resolvable:$true] %s1781_s4 }
  0xc2   : > { %2658 = vpow2.f32 %v842_v49  ;;  %v2478_v51 = vpack.c.bf16 %v945_v48, %v944_v47  ;;  %2240 = vmatprep.mubr.msk.f32.mxu0 %vm558_vm0, %v533_v50  ;;  %s2712_s26 = scalar_lea.vmem %s3395_s4, 16 }
  0xc3   : > { %v3038_v54 = vpop.eup %2648  ;;  %v844_v55 = vmul.f32 1.442695, %v822_v52  ;;  %v846_v56 = vmul.f32 1.442695, %v823_v53  ;;  %p2713_p11 = scmp.ne.s32.totalorder %s3395_s4, %s2712_s26 }
  0xc4   : > { %v3040_v57 = vpop.eup %2650  ;;  %v794_v58 = vpop.xlane.xlu0 %793  ;;  %v864_v59 = vsel %vm558_vm0, %v3038_v54, 0.0  ;;  %2479 = vmatprep.subr.bf16.mxu1 %v2478_v51 }
  0xc5   : > { %v797_v60 = vpop.xlane.xlu1 %796  ;;  %2660 = vpow2.f32 %v844_v55  ;;  %v824_v61 = vsub.f32 %v2999_v16, %v794_v58  ;;  %865 = vadd.xlane.f32.xlu0 %v864_v59  ;;  %v870_v63 = vsel %vm558_vm0, %v3040_v57, 0.0  ;;  %v534_v55 = vld [vmem:[%s3112_s18 + $0x8] sm:$0xff]  ;;  %2481 = vmatpush3.bf16.msra.mxu1 %v2478_v51  ;;  %v535_v58 = vld [vmem:[%s3112_s18 + $0x10] sm:$0xff]  ;;  %v536_v59 = vld [vmem:[%s3112_s18 + $0x18] sm:$0xff]  ;;  %p2714_p12 = pnand %p2713_p11, %p2959_p5 }
  0xc6   : > { %v825_v62 = vsub.f32 %v3002_v17, %v797_v60  ;;  %2662 = vpow2.f32 %v846_v56  ;;  %2241 = vmatmul.mubr.msk.f32.vlgmr.msra.gmra.mrb[0].mxu0 %vm558_vm0, %v534_v55  ;;  %v537_v60 = vld [vmem:[%s3112_s18 + $0x20] sm:$0xff] }
  0xc7   : > { %v3048_v0 = vpop.eup %2652  ;;  %v848_v1 = vmul.f32 1.442695, %v824_v61  ;;  %2243 = vmatprep.mubr.msk.f32.mxu0 %vm558_vm0, %v535_v58  ;;  %v538_v61 = vld [vmem:[%s3112_s18 + $0x28] sm:$0xff]  ;;  %p2715_p13 = pneg %p2714_p12 }
  0xc8   : > { %v850_v2 = vmul.f32 1.442695, %v825_v62  ;;  %v3050_v3 = vpop.eup %2654  ;;  %v800_v4 = vpop.xlane.xlu0 %799  ;;  %v867_v5 = vsel %vm558_vm0, %v3048_v0, 0.0  ;;  %v539_v62 = vld [vmem:[%s3112_s18 + $0x30] sm:$0xff] }
  0xc9   : > { %v803_v6 = vpop.xlane.xlu1 %802  ;;  %2664 = vpow2.f32 %v848_v1  ;;  %v826_v7 = vsub.f32 %v3009_v20, %v800_v4  ;;  %871 = vadd.xlane.f32.xlu0 %v870_v63  ;;  %868 = vadd.xlane.f32.xlu1 %v867_v5  ;;  %v873_v9 = vsel %vm558_vm0, %v3050_v3, 0.0  ;;  %v540_v63 = vld [vmem:[%s3112_s18 + $0x38] sm:$0xff]  ;;  %v541_v1 = vld [vmem:[%s3112_s18 + $0x40] sm:$0xff]  ;;  %v543_v4 = vld [vmem:[%s3112_s18 + $0x50] sm:$0xff] }
  0xca   : > { %v827_v8 = vsub.f32 %v3012_v21, %v803_v6  ;;  %2666 = vpow2.f32 %v850_v2  ;;  %2244 = vmatmul.mubr.msk.f32.gmra.mrb[2].mxu0 %vm558_vm0, %v536_v59  ;;  %v542_v2 = vld [vmem:[%s3112_s18 + $0x48] sm:$0xff]  ;;  %v544_v5 = vld [vmem:[%s3112_s18 + $0x58] sm:$0xff]  ;;  %v545_v6 = vld [vmem:[%s3112_s18 + $0x60] sm:$0xff] }
  0xcb   : > { %v3058_v10 = vpop.eup %2656  ;;  %v852_v11 = vmul.f32 1.442695, %v826_v7  ;;  %2246 = vmatprep.mubr.msk.f32.mxu0 %vm558_vm0, %v537_v60  ;;  %v1146_v7 = vld [vmem:[%s3575_s6] sm:$0xff]  ;;  %v1326_v60 = vld [vmem:[%s3576_s7 + $0x10] sm:$0xff] }
  0xcc   : > { %v854_v12 = vmul.f32 1.442695, %v827_v8  ;;  %v3060_v13 = vpop.eup %2658  ;;  %v806_v14 = vpop.xlane.xlu0 %805  ;;  %v876_v15 = vsel %vm558_vm0, %v3058_v10, 0.0  ;;  %v1147_v8 = vld [vmem:[%s3575_s6 + $0x8] sm:$0xff] }
  0xcd   : > { %v809_v16 = vpop.xlane.xlu1 %808  ;;  %2668 = vpow2.f32 %v852_v11  ;;  %v828_v17 = vsub.f32 %v3019_v24, %v806_v14  ;;  %874 = vadd.xlane.f32.xlu1 %v873_v9  ;;  %877 = vadd.xlane.f32.xlu0 %v876_v15  ;;  %v879_v19 = vsel %vm558_vm0, %v3060_v13, 0.0  ;;  %v1324_v9 = vld [vmem:[%s3576_s7] sm:$0xff]  ;;  %v2482_v11 = vpack.c.bf16 %v1147_v8, %v1146_v7  ;;  %v1148_v14 = vld [vmem:[%s3575_s6 + $0x10] sm:$0xff]  ;;  %v1149_v15 = vld [vmem:[%s3575_s6 + $0x18] sm:$0xff] }
  0xce   : > { %v829_v18 = vsub.f32 %v3022_v25, %v809_v16  ;;  %2670 = vpow2.f32 %v854_v12  ;;  %2247 = vmatmul.mubr.msk.f32.gmra.mrb[4].mxu0 %vm558_vm0, %v538_v61  ;;  %v1325_v12 = vld [vmem:[%s3576_s7 + $0x8] sm:$0xff]  ;;  %v1327_v61 = vld [vmem:[%s3576_s7 + $0x18] sm:$0xff] }
  0xcf   : > { %v3068_v20 = vpop.eup %2660  ;;  %v856_v21 = vmul.f32 1.442695, %v828_v17  ;;  %2249 = vmatprep.mubr.msk.f32.mxu0 %vm558_vm0, %v539_v62  ;;  %v546_v16 = vld [vmem:[%s3112_s18 + $0x68] sm:$0xff]  ;;  %v3173_v17 = vpack.c.bf16 %v1325_v12, %v1324_v9  ;;  %2483 = vmatprep.subr.bf16.mxu0 %v2482_v11 }
  0xd0   : > { %v858_v22 = vmul.f32 1.442695, %v829_v18  ;;  %v3070_v23 = vpop.eup %2662  ;;  %v812_v26 = vpop.xlane.xlu0 %811  ;;  %v882_v27 = vsel %vm558_vm0, %v3068_v20, 0.0  ;;  %v2486_v18 = vpack.c.bf16 %v1149_v15, %v1148_v14  ;;  %2485 = vmatpush3.bf16.msra.mxu0 %v2482_v11  ;;  %v1329_v7 = vld [vmem:[%s3576_s7 + $0x28] sm:$0xff]  ;;  %v1330_v15 = vld [vmem:[%s3576_s7 + $0x30] sm:$0xff] }
  0xd1   : > { %v815_v30 = vpop.xlane.xlu1 %814  ;;  %2672 = vpow2.f32 %v856_v21  ;;  %v830_v24 = vsub.f32 %v3029_v28, %v812_v26  ;;  %880 = vadd.xlane.f32.xlu1 %v879_v19  ;;  %883 = vadd.xlane.f32.xlu0 %v882_v27  ;;  %v885_v31 = vsel %vm558_vm0, %v3070_v23, 0.0  ;;  %v1150_v19 = vld [vmem:[%s3575_s6 + $0x20] sm:$0xff]  ;;  %v547_v21 = vld [vmem:[%s3112_s18 + $0x70] sm:$0xff]  ;;  %v548_v27 = vld [vmem:[%s3112_s18 + $0x78] sm:$0xff]  ;;  %s3303_s18 = scalar_lea.vmem [#allocation2], %s1972_s28  ;;  %s3360_s28 = scalar_lea.vmem %s3553_s11, %s2974_s27 }
  0xd2   : > { %v831_v25 = vsub.f32 %v3032_v29, %v815_v30  ;;  %2674 = vpow2.f32 %v858_v22  ;;  %2250 = vmatmul.mubr.msk.f32.gmra.mrb[6].mxu0 %vm558_vm0, %v540_v63  ;;  %v1151_v22 = vld [vmem:[%s3575_s6 + $0x28] sm:$0xff]  ;;  %2515 = vmatprep.subr.bf16.mxu1 %v3173_v17  ;;  %v1152_v30 = vld [vmem:[%s3575_s6 + $0x30] sm:$0xff] }
  0xd3   : > { %v3078_v32 = vpop.eup %2664  ;;  %v860_v33 = vmul.f32 1.442695, %v830_v24  ;;  %2252 = vmatprep.mubr.msk.f32.mxu0 %vm558_vm0, %v541_v1  ;;  %2487 = vmatprep.subr.bf16.mxu0 %v2486_v18  ;;  %v2490_v26 = vpack.c.bf16 %v1151_v22, %v1150_v19  ;;  %v1153_v24 = vld [vmem:[%s3575_s6 + $0x38] sm:$0xff] }
  0xd4   : > { %v862_v34 = vmul.f32 1.442695, %v831_v25  ;;  %v3080_v35 = vpop.eup %2666  ;;  %v888_v36 = vsel %vm558_vm0, %v3078_v32, 0.0  ;;  %2489 = vmatpush3.bf16.msra.mxu0 %v2486_v18  ;;  %v2494_v25 = vpack.c.bf16 %v1153_v24, %v1152_v30 }
  0xd5   : > { %2676 = vpow2.f32 %v860_v33  ;;  %886 = vadd.xlane.f32.xlu1 %v885_v31  ;;  %889 = vadd.xlane.f32.xlu0 %v888_v36  ;;  %v891_v28 = vsel %vm558_vm0, %v3080_v35, 0.0  ;;  %v1154_v31 = vld [vmem:[%s3575_s6 + $0x40] sm:$0xff]  ;;  %v1155_v33 = vld [vmem:[%s3575_s6 + $0x48] sm:$0xff]  ;;  %v1156_v36 = vld [vmem:[%s3575_s6 + $0x50] sm:$0xff] }
  0xd6   : > { %2678 = vpow2.f32 %v862_v34  ;;  %2253 = vmatmul.mubr.msk.f32.gmra.mrb[8].mxu0 %vm558_vm0, %v542_v2  ;;  %2491 = vmatprep.subr.bf16.mxu0 %v2490_v26  ;;  %v2498_v34 = vpack.c.bf16 %v1155_v33, %v1154_v31 }
  0xd7   : > { %v3086_v29 = vpop.eup %2668  ;;  %2255 = vmatprep.mubr.msk.f32.mxu0 %vm558_vm0, %v543_v4 }
  0xd8   : > { %v3088_v37 = vpop.eup %2670  ;;  %v894_v38 = vsel %vm558_vm0, %v3086_v29, 0.0  ;;  %2493 = vmatpush3.bf16.msra.mxu0 %v2490_v26  ;;  %v1332_v26 = vld [vmem:[%s3576_s7 + $0x40] sm:$0xff] }
  0xd9   : > { %892 = vadd.xlane.f32.xlu1 %v891_v28  ;;  %895 = vadd.xlane.f32.xlu0 %v894_v38  ;;  %v897_v39 = vsel %vm558_vm0, %v3088_v37, 0.0  ;;  %v1157_v28 = vld [vmem:[%s3575_s6 + $0x58] sm:$0xff] }
  0xda   : > { %2256 = vmatmul.mubr.msk.f32.gmra.mrb[10].mxu0 %vm558_vm0, %v544_v5  ;;  %2495 = vmatprep.subr.bf16.mxu0 %v2494_v25  ;;  %v2502_v38 = vpack.c.bf16 %v1157_v28, %v1156_v36  ;;  %v2518_v5 = vpack.c.bf16 %v1327_v61, %v1326_v60  ;;  %v1335_v36 = vld [vmem:[%s3576_s7 + $0x58] sm:$0xff] }
  0xdb   : > { %v3100_v42 = vpop.eup %2672  ;;  %2258 = vmatprep.mubr.msk.f32.mxu0 %vm558_vm0, %v545_v6  ;;  %v1328_v6 = vld [vmem:[%s3576_s7 + $0x20] sm:$0xff] }
  0xdc   : > { %v3102_v44 = vpop.eup %2674  ;;  %v900_v45 = vsel %vm558_vm0, %v3100_v42, 0.0  ;;  %2497 = vmatpush3.bf16.msra.mxu0 %v2494_v25  ;;  %v2522_v12 = vpack.c.bf16 %v1329_v7, %v1328_v6 }
  0xdd   : > { %898 = vadd.xlane.f32.xlu1 %v897_v39  ;;  %901 = vadd.xlane.f32.xlu0 %v900_v45  ;;  %v903_v46 = vsel %vm558_vm0, %v3102_v44, 0.0  ;;  %v1158_v39 = vld [vmem:[%s3575_s6 + $0x60] sm:$0xff]  ;;  %v1161_v45 = vld [vmem:[%s3575_s6 + $0x78] sm:$0xff] }
  0xde   : > { %2259 = vmatmul.mubr.msk.f32.gmra.mrb[12].mxu0 %vm558_vm0, %v546_v16  ;;  %2499 = vmatprep.subr.bf16.mxu0 %v2498_v34  ;;  %v2506_v41 = vpack.c.bf16 %v1159_v40, %v1158_v39  ;;  %v1331_v16 = vld [vmem:[%s3576_s7 + $0x38] sm:$0xff] }
  0xdf   : > { %v3120_v49 = vpop.eup %2676  ;;  %2261 = vmatprep.mubr.msk.f32.mxu0 %vm558_vm0, %v547_v21  ;;  %v2526_v21 = vpack.c.bf16 %v1331_v16, %v1330_v15 }
  0xe0   : > { %v3123_v52 = vpop.eup %2678  ;;  %v906_v53 = vsel %vm558_vm0, %v3120_v49, 0.0  ;;  %2501 = vmatpush3.bf16.msra.mxu0 %v2498_v34  ;;  %v1334_v34 = vld [vmem:[%s3576_s7 + $0x50] sm:$0xff] }
  0xe1   : > { %904 = vadd.xlane.f32.xlu1 %v903_v46  ;;  %907 = vadd.xlane.f32.xlu0 %v906_v53  ;;  %v909_v56 = vsel %vm558_vm0, %v3123_v52, 0.0  ;;  %v2510_v46 = vpack.c.bf16 %v1161_v45, %v1160_v43  ;;  %v1337_v43 = vld [vmem:[%s3576_s7 + $0x68] sm:$0xff] }
  0xe2   : > { %2262 = vmatmul.mubr.msk.f32.gmra.mrb[14].mxu0 %vm558_vm0, %v548_v27  ;;  %2503 = vmatprep.subr.bf16.mxu0 %v2502_v38  ;;  %v1333_v27 = vld [vmem:[%s3576_s7 + $0x48] sm:$0xff] }
  0xe3   : > { %v2530_v31 = vpack.c.bf16 %v1333_v27, %v1332_v26 }
  0xe4   : > { %2505 = vmatpush3.bf16.msra.mxu0 %v2502_v38 }
  0xe5   : > { %910 = vadd.xlane.f32.xlu1 %v909_v56  ;;  %2507 = vmatprep.subr.bf16.mxu0 %v2506_v41 }
  0xe8   : > { %2509 = vmatpush3.bf16.msra.mxu0 %v2506_v41  ;;  %v1336_v41 = vld [vmem:[%s3576_s7 + $0x60] sm:$0xff] }
  0xe9   : > { %2511 = vmatprep.subr.bf16.mxu0 %v2510_v46 }
  0xec   : > { %2513 = vmatpush3.bf16.msra.mxu0 %v2510_v46 }
 0x152   : > { %v866_v47 = vpop.xlane.xlu0 %865 }
 0x153   : > { %2680 = vrcp.f32 %v866_v47  ;;  %v2538_v47 = vpack.c.bf16 %v1337_v43, %v1336_v41 }
 0x156   : > { %v869_v48 = vpop.xlane.xlu1 %868  ;;  %v872_v50 = vpop.xlane.xlu0 %871 }
 0x157   : > { %2682 = vrcp.f32 %v869_v48  ;;  %v1338_v48 = vld [vmem:[%s3576_s7 + $0x70] sm:$0xff] }
 0x158   : > { %2684 = vrcp.f32 %v872_v50  ;;  %v1339_v50 = vld [vmem:[%s3576_s7 + $0x78] sm:$0xff] }
 0x15a   : > { %v875_v51 = vpop.xlane.xlu1 %874  ;;  %v878_v53 = vpop.xlane.xlu0 %877 }
 0x15b   : > { %2686 = vrcp.f32 %v875_v51 }
 0x15c   : > { %2688 = vrcp.f32 %v878_v53 }
 0x15d   : > { %v2681_v55 = vpop.eup %2680 }
 0x15e   : > { %v881_v56 = vpop.xlane.xlu1 %880  ;;  %v884_v58 = vpop.xlane.xlu0 %883  ;;  %v913_v59 = vmul.f32 %v2681_v55, %v3038_v54 }
 0x15f   : > { %2690 = vrcp.f32 %v881_v56 }
 0x160   : > { %2692 = vrcp.f32 %v884_v58  ;;  %2268 = vmatprep.mubr.msk.f32.mxu1 %vm558_vm0, %v913_v59 }
 0x161   : > { %v2683_v62 = vpop.eup %2682 }
 0x162   : > { %v2685_v63 = vpop.eup %2684  ;;  %v887_v1 = vpop.xlane.xlu1 %886  ;;  %v915_v4 = vmul.f32 %v2683_v62, %v3048_v0  ;;  %v2836_v62 = vmov 0.0|0.0  }
 0x163   : > { %v890_v2 = vpop.xlane.xlu0 %889  ;;  %2694 = vrcp.f32 %v887_v1  ;;  %v917_v54 = vmul.f32 %v2685_v63, %v3040_v57  ;;  %2546 = vmatprep.subr.bf16.mxu0 %v2836_v62 }
 0x164   : > { %2696 = vrcp.f32 %v890_v2  ;;  %2269 = vmatmul.mubr.msk.f32.vlgmr.msra.gmra.mrb[0].mxu1 %vm558_vm0, %v915_v4 }
 0x165   : > { %v2687_v8 = vpop.eup %2686  ;;  %2271 = vmatprep.mubr.msk.f32.mxu1 %vm558_vm0, %v917_v54  ;;  %2517 = vmatpush3.bf16.msra.mxu1 %v3173_v17 }
 0x166   : > { %v2689_v0 = vpop.eup %2688  ;;  %v893_v9 = vpop.xlane.xlu1 %892  ;;  %v919_v57 = vmul.f32 %v2687_v8, %v3050_v3  ;;  %2519 = vmatprep.subr.bf16.mxu1 %v2518_v5 }
 0x167   : > { %v896_v11 = vpop.xlane.xlu0 %895  ;;  %2698 = vrcp.f32 %v893_v9  ;;  %v921_v14 = vmul.f32 %v2689_v0, %v3058_v10 }
 0x168   : > { %2700 = vrcp.f32 %v896_v11  ;;  %2272 = vmatmul.mubr.msk.f32.gmra.mrb[2].mxu1 %vm558_vm0, %v919_v57 }
 0x169   : > { %v2691_v17 = vpop.eup %2690  ;;  %2274 = vmatprep.mubr.msk.f32.mxu1 %vm558_vm0, %v921_v14  ;;  %2521 = vmatpush3.bf16.msra.mxu1 %v2518_v5 }
 0x16a   : > { %v2693_v3 = vpop.eup %2692  ;;  %v899_v18 = vpop.xlane.xlu1 %898  ;;  %v923_v10 = vmul.f32 %v2691_v17, %v3060_v13  ;;  %2523 = vmatprep.subr.bf16.mxu1 %v2522_v12 }
 0x16b   : > { %v902_v19 = vpop.xlane.xlu0 %901  ;;  %2702 = vrcp.f32 %v899_v18  ;;  %v925_v22 = vmul.f32 %v2693_v3, %v3068_v20 }
 0x16c   : > { %2704 = vrcp.f32 %v902_v19  ;;  %2275 = vmatmul.mubr.msk.f32.gmra.mrb[4].mxu1 %vm558_vm0, %v923_v10 }
 0x16d   : > { %v2695_v30 = vpop.eup %2694  ;;  %2277 = vmatprep.mubr.msk.f32.mxu1 %vm558_vm0, %v925_v22  ;;  %2525 = vmatpush3.bf16.msra.mxu1 %v2522_v12 }
 0x16e   : > { %v2697_v13 = vpop.eup %2696  ;;  %v905_v24 = vpop.xlane.xlu1 %904  ;;  %v927_v20 = vmul.f32 %v2695_v30, %v3070_v23  ;;  %2527 = vmatprep.subr.bf16.mxu1 %v2526_v21 }
 0x16f   : > { %v908_v25 = vpop.xlane.xlu0 %907  ;;  %2706 = vrcp.f32 %v905_v24  ;;  %v929_v33 = vmul.f32 %v2697_v13, %v3078_v32  ;;  %v2534_v32 = vpack.c.bf16 %v1335_v36, %v1334_v34 }
 0x170   : > { %2708 = vrcp.f32 %v908_v25  ;;  %2278 = vmatmul.mubr.msk.f32.gmra.mrb[6].mxu1 %vm558_vm0, %v927_v20 }
 0x171   : > { %v2699_v28 = vpop.eup %2698  ;;  %2280 = vmatprep.mubr.msk.f32.mxu1 %vm558_vm0, %v929_v33  ;;  %2529 = vmatpush3.bf16.msra.mxu1 %v2526_v21 }
 0x172   : > { %v2701_v23 = vpop.eup %2700  ;;  %v911_v38 = vpop.xlane.xlu1 %910  ;;  %v931_v39 = vmul.f32 %v2699_v28, %v3080_v35  ;;  %2531 = vmatprep.subr.bf16.mxu1 %v2530_v31  ;;  %v2838_v28 = vmov 0.0  }
 0x173   : > { %2710 = vrcp.f32 %v911_v38  ;;  %v933_v40 = vmul.f32 %v2701_v23, %v3086_v29  ;;  %v1501_v23 = vld [vmem:[%s3550_s8] sm:$0x1] }
 0x174   : > { %2281 = vmatmul.mubr.msk.f32.gmra.mrb[8].mxu1 %vm558_vm0, %v931_v39  ;;  %v1998_v38 = vld [vmem:[%s3578_s5] ss:$0 sm:$0xff] }
 0x175   : > { %v2703_v45 = vpop.eup %2702  ;;  %2283 = vmatprep.mubr.msk.f32.mxu1 %vm558_vm0, %v933_v40  ;;  %2533 = vmatpush3.bf16.msra.mxu1 %v2530_v31 }
 0x176   : > { %v2705_v35 = vpop.eup %2704  ;;  %v935_v46 = vmul.f32 %v2703_v45, %v3088_v37  ;;  %2535 = vmatprep.subr.bf16.mxu1 %v2534_v32 }
 0x177   : > { %v937_v29 = vmul.f32 %v2705_v35, %v3100_v42  ;;  %v2542_v42 = vpack.c.bf16 %v1339_v50, %v1338_v48 }
 0x178   : > { %2284 = vmatmul.mubr.msk.f32.gmra.mrb[10].mxu1 %vm558_vm0, %v935_v46 }
 0x179   : > { %v2707_v51 = vpop.eup %2706  ;;  %2286 = vmatprep.mubr.msk.f32.mxu1 %vm558_vm0, %v937_v29  ;;  %2537 = vmatpush3.bf16.msra.mxu1 %v2534_v32 }
 0x17a   : > { %v2709_v37 = vpop.eup %2708  ;;  %v939_v53 = vmul.f32 %v2707_v51, %v3102_v44  ;;  %2539 = vmatprep.subr.bf16.mxu1 %v2538_v47  ;;  %v3298_v44 = vld [vmem:[%s3577_s3] ss:$0 sm:$0xff] }
 0x17b   : > { %v941_v55 = vmul.f32 %v2709_v37, %v3120_v49 }
 0x17c   : > { %2287 = vmatmul.mubr.msk.f32.gmra.mrb[12].mxu1 %vm558_vm0, %v939_v53 }
 0x17d   : > { %v2711_v56 = vpop.eup %2710  ;;  %2289 = vmatprep.mubr.msk.f32.mxu1 %vm558_vm0, %v941_v55  ;;  %2541 = vmatpush3.bf16.msra.mxu1 %v2538_v47 }
 0x17e   : > { %v943_v58 = vmul.f32 %v2711_v56, %v3123_v52  ;;  %2543 = vmatprep.subr.bf16.mxu1 %v2542_v42 }
 0x180   : > { %2290 = vmatmul.mubr.msk.f32.gmra.mrb[14].mxu1 %vm558_vm0, %v943_v58 }
 0x181   : > { %2545 = vmatpush3.bf16.msra.mxu1 %v2542_v42 }
 0x182   : > { %2570 = vmatprep.subr.bf16.mxu1 %v2836_v62 }
 0x199   : > { %v2242_v49 = vpop.f32.mrb[0].mxu0 }
 0x19a   : > { %v679_v59 = vadd.f32 %v2242_v49, %v3298_v44  ;;  %v673_v60 = vpop.f32.mrb[1].mxu0 }
 0x19b   : > { %v674_v61 = vadd.f32 %v3298_v44, %v673_v60 }
 0x19d   : > { %v2547_v52 = vpack.c.bf16 %v679_v59, %v674_v61  ;;  %2324 = vmatprep.mubr.f32.mxu0 %v674_v61  ;;  %v2245_v63 = vpop.f32.mrb[2].mxu0 }
 0x19e   : > { %2325 = vmatmul.mubr.f32.vlgmr.msra.gmra.mrb[16].mxu0 %v679_v59  ;;  %v689_v1 = vadd.f32 %v2245_v63, %v3298_v44  ;;  %v683_v2 = vpop.f32.mrb[3].mxu0 }
 0x19f   : > { %2059 = vst [vmem:[%s3303_s18] sm:$0xff] %v2547_v52   ;;  %2548 = vmatpush3.bf16.xpose.msra.mxu0 %v2547_v52  ;;  %v684_v4 = vadd.f32 %v3298_v44, %v683_v2 }
 0x1a0   : > { %2549 = vmatprep.subr.bf16.mxu0 %v2836_v62 }
 0x1a1   : > { %v2550_v5 = vpack.c.bf16 %v689_v1, %v684_v4  ;;  %2327 = vmatprep.mubr.f32.mxu0 %v684_v4  ;;  %v2248_v54 = vpop.f32.mrb[4].mxu0 }
 0x1a2   : > { %2328 = vmatmul.mubr.f32.gmra.mrb[18].mxu0 %v689_v1  ;;  %v699_v6 = vadd.f32 %v2248_v54, %v3298_v44  ;;  %v693_v7 = vpop.f32.mrb[5].mxu0 }
 0x1a3   : > { %2095 = vst [vmem:[%s3303_s18 + $0x8] sm:$0xff] %v2550_v5   ;;  %v694_v8 = vadd.f32 %v3298_v44, %v693_v7 }
 0x1a5   : > { %v2553_v0 = vpack.c.bf16 %v699_v6, %v694_v8  ;;  %2330 = vmatprep.mubr.f32.mxu0 %v694_v8  ;;  %v2251_v9 = vpop.f32.mrb[6].mxu0 }
 0x1a6   : > { %2331 = vmatmul.mubr.f32.gmra.mrb[20].mxu0 %v699_v6  ;;  %v709_v11 = vadd.f32 %v2251_v9, %v3298_v44  ;;  %v703_v57 = vpop.f32.mrb[7].mxu0 }
 0x1a7   : > { %2551 = vmatpush3.bf16.xpose.msra.mxu0 %v2550_v5  ;;  %2096 = vst [vmem:[%s3303_s18 + $0x10] sm:$0xff] %v2553_v0   ;;  %v704_v12 = vadd.f32 %v3298_v44, %v703_v57 }
 0x1a8   : > { %2552 = vmatprep.subr.bf16.mxu0 %v2836_v62 }
 0x1a9   : > { %v2556_v14 = vpack.c.bf16 %v709_v11, %v704_v12  ;;  %2333 = vmatprep.mubr.f32.mxu0 %v704_v12  ;;  %v2254_v15 = vpop.f32.mrb[8].mxu0 }
 0x1aa   : > { %2334 = vmatmul.mubr.f32.gmra.mrb[22].mxu0 %v709_v11  ;;  %v719_v16 = vadd.f32 %v2254_v15, %v3298_v44  ;;  %v713_v17 = vpop.f32.mrb[9].mxu0  ;;  %v1573_v15 = vld [vmem:[%s3551_s9] sm:$0x1] }
 0x1ab   : > { %2097 = vst [vmem:[%s3303_s18 + $0x18] sm:$0xff] %v2556_v14   ;;  %v714_v3 = vadd.f32 %v3298_v44, %v713_v17 }
 0x1ad   : > { %v2559_v18 = vpack.c.bf16 %v719_v16, %v714_v3  ;;  %2336 = vmatprep.mubr.f32.mxu0 %v714_v3  ;;  %v2257_v19 = vpop.f32.mrb[10].mxu0 }
 0x1ae   : > { %2337 = vmatmul.mubr.f32.gmra.mrb[24].mxu0 %v719_v16  ;;  %v729_v10 = vadd.f32 %v2257_v19, %v3298_v44  ;;  %v723_v21 = vpop.f32.mrb[11].mxu0 }
 0x1af   : > { %2554 = vmatpush3.bf16.xpose.msra.mxu0 %v2553_v0  ;;  %2098 = vst [vmem:[%s3303_s18 + $0x20] sm:$0xff] %v2559_v18   ;;  %v724_v22 = vadd.f32 %v3298_v44, %v723_v21 }
 0x1b0   : > { %2555 = vmatprep.subr.bf16.mxu0 %v2836_v62 }
 0x1b1   : > { %v2562_v26 = vpack.c.bf16 %v729_v10, %v724_v22  ;;  %2339 = vmatprep.mubr.f32.mxu0 %v724_v22  ;;  %v2260_v27 = vpop.f32.mrb[12].mxu0 }
 0x1b2   : > { %2340 = vmatmul.mubr.f32.gmra.mrb[26].mxu0 %v729_v10  ;;  %v739_v30 = vadd.f32 %v2260_v27, %v3298_v44  ;;  %v733_v13 = vpop.f32.mrb[13].mxu0 }
 0x1b3   : > { %2099 = vst [vmem:[%s3303_s18 + $0x28] sm:$0xff] %v2562_v26   ;;  %v734_v24 = vadd.f32 %v3298_v44, %v733_v13 }
 0x1b5   : > { %v2565_v25 = vpack.c.bf16 %v739_v30, %v734_v24  ;;  %2342 = vmatprep.mubr.f32.mxu0 %v734_v24  ;;  %v2263_v20 = vpop.f32.mrb[14].mxu0 }
 0x1b6   : > { %2343 = vmatmul.mubr.f32.gmra.mrb[28].mxu0 %v739_v30  ;;  %v749_v31 = vadd.f32 %v2263_v20, %v3298_v44  ;;  %v743_v33 = vpop.f32.mrb[15].mxu0 }
 0x1b7   : > { %2557 = vmatpush3.bf16.xpose.msra.mxu0 %v2556_v14  ;;  %2100 = vst [vmem:[%s3303_s18 + $0x30] sm:$0xff] %v2565_v25   ;;  %v744_v34 = vadd.f32 %v3298_v44, %v743_v33 }
 0x1b8   : > { %2558 = vmatprep.subr.bf16.mxu0 %v2836_v62 }
 0x1b9   : > { %v2568_v36 = vpack.c.bf16 %v749_v31, %v744_v34  ;;  %2345 = vmatprep.mubr.f32.mxu0 %v744_v34 }
 0x1ba   : > { %2346 = vmatmul.mubr.f32.gmra.mrb[30].mxu0 %v749_v31 }
 0x1bb   : > { %2101 = vst [vmem:[%s3303_s18 + $0x38] sm:$0xff] %v2568_v36   ;;  %2436 = vmatprep.mubr.msk.f32.mxu0 %vm2837_vm1, %v2838_v28 }
 0x1bf   : > { %2560 = vmatpush3.bf16.xpose.msra.mxu0 %v2559_v18 }
 0x1c0   : > { %2561 = vmatprep.subr.bf16.mxu0 %v2836_v62 }
 0x1c7   : > { %2563 = vmatpush3.bf16.xpose.msra.mxu0 %v2562_v26 }
 0x1c8   : > { %2564 = vmatprep.subr.bf16.mxu0 %v2836_v62 }
 0x1cf   : > { %2566 = vmatpush3.bf16.xpose.msra.mxu0 %v2565_v25 }
 0x1d0   : > { %2567 = vmatprep.subr.bf16.mxu0 %v2836_v62 }
 0x1d7   : > { %2569 = vmatpush3.bf16.xpose.msra.mxu0 %v2568_v36 }
 0x1de   : > { %2437 = vmatmul.mubr.f32.vlgmr.msra.gmra.mrb[32].mxu0 %v1501_v23 }
 0x237   : > { %v2270_v39 = vpop.f32.mrb[0].mxu1 }
 0x238   : > { %v1073_v32 = vadd.f32 %v2270_v39, %v1998_v38  ;;  %v1067_v40 = vpop.f32.mrb[1].mxu1 }
 0x239   : > { %v1068_v41 = vadd.f32 %v1998_v38, %v1067_v40 }
 0x23b   : > { %v2571_v43 = vpack.c.bf16 %v1073_v32, %v1068_v41  ;;  %v2273_v45 = vpop.f32.mrb[2].mxu1  ;;  %2380 = vmatprep.mubr.f32.mxu1 %v1068_v41 }
 0x23c   : > { %v1083_v35 = vadd.f32 %v2273_v45, %v1998_v38  ;;  %v1077_v46 = vpop.f32.mrb[3].mxu1  ;;  %2381 = vmatmul.mubr.f32.vlgmr.msra.gmra.mrb[16].mxu1 %v1073_v32 }
 0x23d   : > { %v1078_v47 = vadd.f32 %v1998_v38, %v1077_v46  ;;  %2572 = vmatpush3.bf16.xpose.msra.mxu1 %v2571_v43 }
 0x23e   : > { %2573 = vmatprep.subr.bf16.mxu1 %v2836_v62 }
 0x23f   : > { %v2574_v29 = vpack.c.bf16 %v1083_v35, %v1078_v47  ;;  %v2276_v48 = vpop.f32.mrb[4].mxu1  ;;  %2383 = vmatprep.mubr.f32.mxu1 %v1078_v47 }
 0x240   : > { %v1093_v50 = vadd.f32 %v2276_v48, %v1998_v38  ;;  %v1087_v51 = vpop.f32.mrb[5].mxu1  ;;  %2384 = vmatmul.mubr.f32.gmra.mrb[18].mxu1 %v1083_v35 }
 0x241   : > { %v1088_v37 = vadd.f32 %v1998_v38, %v1087_v51 }
 0x243   : > { %v2577_v53 = vpack.c.bf16 %v1093_v50, %v1088_v37  ;;  %v2279_v42 = vpop.f32.mrb[6].mxu1  ;;  %2386 = vmatprep.mubr.f32.mxu1 %v1088_v37 }
 0x244   : > { %v1103_v55 = vadd.f32 %v2279_v42, %v1998_v38  ;;  %v1097_v56 = vpop.f32.mrb[7].mxu1  ;;  %2387 = vmatmul.mubr.f32.gmra.mrb[20].mxu1 %v1093_v50 }
 0x245   : > { %v1098_v58 = vadd.f32 %v1998_v38, %v1097_v56  ;;  %2575 = vmatpush3.bf16.xpose.msra.mxu1 %v2574_v29 }
 0x246   : > { %2576 = vmatprep.subr.bf16.mxu1 %v2836_v62 }
 0x247   : > { %v2580_v44 = vpack.c.bf16 %v1103_v55, %v1098_v58  ;;  %v2282_v49 = vpop.f32.mrb[8].mxu1  ;;  %2389 = vmatprep.mubr.f32.mxu1 %v1098_v58 }
 0x248   : > { %v1113_v59 = vadd.f32 %v2282_v49, %v1998_v38  ;;  %v1107_v60 = vpop.f32.mrb[9].mxu1  ;;  %2390 = vmatmul.mubr.f32.gmra.mrb[22].mxu1 %v1103_v55 }
 0x249   : > { %v1108_v61 = vadd.f32 %v1998_v38, %v1107_v60 }
 0x24b   : > { %v2583_v52 = vpack.c.bf16 %v1113_v59, %v1108_v61  ;;  %v2285_v63 = vpop.f32.mrb[10].mxu1  ;;  %2392 = vmatprep.mubr.f32.mxu1 %v1108_v61 }
 0x24c   : > { %v1123_v1 = vadd.f32 %v2285_v63, %v1998_v38  ;;  %v1117_v2 = vpop.f32.mrb[11].mxu1  ;;  %2393 = vmatmul.mubr.f32.gmra.mrb[24].mxu1 %v1113_v59 }
 0x24d   : > { %v1118_v4 = vadd.f32 %v1998_v38, %v1117_v2  ;;  %2578 = vmatpush3.bf16.xpose.msra.mxu1 %v2577_v53 }
 0x24e   : > { %2579 = vmatprep.subr.bf16.mxu1 %v2836_v62 }
 0x24f   : > { %v2586_v5 = vpack.c.bf16 %v1123_v1, %v1118_v4  ;;  %v2288_v54 = vpop.f32.mrb[12].mxu1  ;;  %2395 = vmatprep.mubr.f32.mxu1 %v1118_v4 }
 0x250   : > { %v1133_v6 = vadd.f32 %v2288_v54, %v1998_v38  ;;  %v1127_v7 = vpop.f32.mrb[13].mxu1  ;;  %2396 = vmatmul.mubr.f32.gmra.mrb[26].mxu1 %v1123_v1 }
 0x251   : > { %v1128_v8 = vadd.f32 %v1998_v38, %v1127_v7 }
 0x253   : > { %v2589_v0 = vpack.c.bf16 %v1133_v6, %v1128_v8  ;;  %v2291_v9 = vpop.f32.mrb[14].mxu1  ;;  %2398 = vmatprep.mubr.f32.mxu1 %v1128_v8 }
 0x254   : > { %v1143_v11 = vadd.f32 %v2291_v9, %v1998_v38  ;;  %v1137_v57 = vpop.f32.mrb[15].mxu1  ;;  %2399 = vmatmul.mubr.f32.gmra.mrb[28].mxu1 %v1133_v6 }
 0x255   : > { %v1138_v12 = vadd.f32 %v1998_v38, %v1137_v57  ;;  %2581 = vmatpush3.bf16.xpose.msra.mxu1 %v2580_v44 }
 0x256   : > { %2582 = vmatprep.subr.bf16.mxu1 %v2836_v62 }
 0x257   : > { %v2592_v14 = vpack.c.bf16 %v1143_v11, %v1138_v12  ;;  %2401 = vmatprep.mubr.f32.mxu1 %v1138_v12 }
 0x258   : > { %2402 = vmatmul.mubr.f32.gmra.mrb[30].mxu1 %v1143_v11 }
 0x259   : > { %2471 = vmatprep.mubr.msk.f32.mxu1 %vm2837_vm1, %v2838_v28 }
 0x25d   : > { %2584 = vmatpush3.bf16.xpose.msra.mxu1 %v2583_v52 }
 0x25e   : > { %2585 = vmatprep.subr.bf16.mxu1 %v2836_v62 }
 0x265   : > { %2587 = vmatpush3.bf16.xpose.msra.mxu1 %v2586_v5 }
 0x266   : > { %2588 = vmatprep.subr.bf16.mxu1 %v2836_v62 }
 0x26d   : > { %2590 = vmatpush3.bf16.xpose.msra.mxu1 %v2589_v0 }
 0x26e   : > { %2591 = vmatprep.subr.bf16.mxu1 %v2836_v62 }
 0x271   : > { %v2326_v62 = vpop.f32.mrb[16].mxu0 }
 0x272   : > { %1309 = vst.msk [vmem:[%s3360_s28 + $0x8] sm:$0xff] %vm1307_vm2, %v2326_v62  ;;  %v1228_v16 = vpop.f32.mrb[17].mxu0 }
 0x273   : > { %1308 = vst.msk [vmem:[%s3360_s28] sm:$0xff] %vm1307_vm2, %v1228_v16 }
 0x275   : > { %2593 = vmatpush3.bf16.xpose.msra.mxu1 %v2592_v14  ;;  %v2329_v17 = vpop.f32.mrb[18].mxu0 }
 0x276   : > { %1311 = vst.msk [vmem:[%s3360_s28 + $0x18] sm:$0xff] %vm1307_vm2, %v2329_v17  ;;  %v1238_v3 = vpop.f32.mrb[19].mxu0 }
 0x277   : > { %1310 = vst.msk [vmem:[%s3360_s28 + $0x10] sm:$0xff] %vm1307_vm2, %v1238_v3 }
 0x279   : > { %v2332_v18 = vpop.f32.mrb[20].mxu0 }
 0x27a   : > { %1313 = vst.msk [vmem:[%s3360_s28 + $0x28] sm:$0xff] %vm1307_vm2, %v2332_v18  ;;  %v1248_v19 = vpop.f32.mrb[21].mxu0 }
 0x27b   : > { %1312 = vst.msk [vmem:[%s3360_s28 + $0x20] sm:$0xff] %vm1307_vm2, %v1248_v19 }
 0x27c   : > { %2472 = vmatmul.mubr.f32.vlgmr.msra.gmra.mrb[32].mxu1 %v1573_v15 }
 0x27d   : > { %v2335_v10 = vpop.f32.mrb[22].mxu0 }
 0x27e   : > { %1315 = vst.msk [vmem:[%s3360_s28 + $0x38] sm:$0xff] %vm1307_vm2, %v2335_v10  ;;  %v1258_v21 = vpop.f32.mrb[23].mxu0 }
 0x27f   : > { %1314 = vst.msk [vmem:[%s3360_s28 + $0x30] sm:$0xff] %vm1307_vm2, %v1258_v21 }
 0x281   : > { %v2338_v22 = vpop.f32.mrb[24].mxu0 }
 0x282   : > { %1317 = vst.msk [vmem:[%s3360_s28 + $0x48] sm:$0xff] %vm1307_vm2, %v2338_v22  ;;  %v1268_v26 = vpop.f32.mrb[25].mxu0 }
 0x283   : > { %1316 = vst.msk [vmem:[%s3360_s28 + $0x40] sm:$0xff] %vm1307_vm2, %v1268_v26 }
 0x285   : > { %v2341_v27 = vpop.f32.mrb[26].mxu0 }
 0x286   : > { %1319 = vst.msk [vmem:[%s3360_s28 + $0x58] sm:$0xff] %vm1307_vm2, %v2341_v27  ;;  %v1278_v30 = vpop.f32.mrb[27].mxu0 }
 0x287   : > { %1318 = vst.msk [vmem:[%s3360_s28 + $0x50] sm:$0xff] %vm1307_vm2, %v1278_v30 }
 0x289   : > { %v2344_v13 = vpop.f32.mrb[28].mxu0 }
 0x28a   : > { %1321 = vst.msk [vmem:[%s3360_s28 + $0x68] sm:$0xff] %vm1307_vm2, %v2344_v13  ;;  %v1288_v24 = vpop.f32.mrb[29].mxu0 }
 0x28b   : > { %1320 = vst.msk [vmem:[%s3360_s28 + $0x60] sm:$0xff] %vm1307_vm2, %v1288_v24 }
 0x28d   : > { %v2347_v25 = vpop.f32.mrb[30].mxu0 }
 0x28e   : > { %1323 = vst.msk [vmem:[%s3360_s28 + $0x78] sm:$0xff] %vm1307_vm2, %v2347_v25  ;;  %v1298_v20 = vpop.f32.mrb[31].mxu0 }
 0x28f   : > { %1322 = vst.msk [vmem:[%s3360_s28 + $0x70] sm:$0xff] %vm1307_vm2, %v1298_v20  ;;  %s2839_s28 = smov [#allocation4]  }
 0x2b1   : > { %v1568_v31 = vpop.f32.mrb[32].mxu0 }
 0x2b2   : > { %1572 = vst [vmem:[%s501_s0] sm:$0x1] %v1568_v31  ;;  %v2438_v33 = vpop.f32.mrb[33].mxu0  ;;  %s2716_s0 = sshll.u32 %s2839_s28, 4  ;;  %s2717_s0 = int_to_ptr.vmem [resolvable:$false] %s2716_s0 }
 0x2b3   : > { %s2718_s3 = scalar_lea.vmem %s2717_s0, 32  ;;  %p2719_p0 = scmp.lt.s32.totalorder %s3395_s4, %s2717_s0 }
 0x2b4   : > { %p2720_p1 = scmp.lt.s32.totalorder %s2718_s3, %s2712_s26 }
 0x2b6   : > { %p2721_p2 = por %p2720_p1, %p2719_p0 }
 0x2b8   : > { %p2722_p3 = pnand %p2721_p2, %p2715_p13 }
 0x2ba   : > { %2725 = shalt.err (!%p2722_p3)
}
 0x2bb   : > { %s2726_s5 = scalar_lea.hbm %s1779_s21, 16  ;;  %s2730_s20 = scalar_lea.hbm %s3555_s13, 32 }
 0x2bc   : > { %p2727_p4 = scmp.ne.s32.totalorder %s1779_s21, %s2726_s5  ;;  %p2731_p9 = scmp.lt.u32.totalorder %s1779_s21, %s3555_s13 }
 0x2bd   : > { %p2732_p10 = scmp.lt.u32.totalorder %s2730_s20, %s2726_s5  ;;  %p2734_p12 = scmp.lt.u32.totalorder %s2726_s5, %s1779_s21 }
 0x2be   : > { %p2728_p7 = pnand %p2727_p4, %p2959_p5 }
 0x2bf   : > { %p2733_p11 = por %p2732_p10, %p2731_p9 }
 0x2c0   : > { %p2729_p8 = pneg %p2728_p7 }
 0x2c1   : > { %p2735_p0 = por %p2734_p12, %p2733_p11 }
 0x2c3   : > { %p2736_p13 = pnand %p2735_p0, %p2729_p8 }
 0x2c5   : > { %2739 = shalt.err (!%p2736_p13)
}
 0x2c6   : > { %2595 = dma.vmem_to_hbm [thread:$0]  (%p2959_p5), %s3395_s4, 16, %s1779_s21, %s3402_s2  }
 0x2c7   : > { %s2054_s3 = sshll.u32 %s2940_s17, 10  ;;  %s1757_s26 = sshll.u32 %s3303_s18, 4  ;;  %s3428_s26 = int_to_ptr.vmem [resolvable:$true] %s1757_s26 }
 0x2c8   : > { %s3426_s7 = scalar_lea.hbm %s3552_s10, %s2054_s3  ;;  %s1726_s5 = scalar_lea.sflag [#allocation3], %s3293_s1 }
 0x2c9   : > { %s2740_s0 = scalar_lea.vmem %s3428_s26, 1024  ;;  %s2840_s15 = smov [#allocation2]  }
 0x2ca   : > { %p2741_p1 = scmp.ne.s32.totalorder %s3428_s26, %s2740_s0  ;;  %s2744_s4 = sshll.u32 %s2840_s15, 4  ;;  %s2745_s4 = int_to_ptr.vmem [resolvable:$false] %s2744_s4 }
 0x2cb   : > { %s2746_s17 = scalar_lea.vmem %s2745_s4, 2048  ;;  %p2747_p4 = scmp.lt.s32.totalorder %s3428_s26, %s2745_s4 }
 0x2cc   : > { %p2742_p2 = pnand %p2741_p1, %p2959_p5  ;;  %p2748_p7 = scmp.lt.s32.totalorder %s2746_s17, %s2740_s0 }
 0x2ce   : > { %p2743_p3 = pneg %p2742_p2  ;;  %p2749_p8 = por %p2748_p7, %p2747_p4 }
 0x2d0   : > { %p2750_p9 = pnand %p2749_p8, %p2743_p3 }
 0x2d2   : > { %2753 = shalt.err (!%p2750_p9)
}
 0x2d3   : > { %s2754_s18 = scalar_lea.hbm %s3426_s7, 1024  ;;  %s2758_s20 = scalar_lea.hbm %s3552_s10, 2048 }
 0x2d4   : > { %p2755_p10 = scmp.ne.s32.totalorder %s3426_s7, %s2754_s18  ;;  %p2759_p0 = scmp.lt.u32.totalorder %s3426_s7, %s3552_s10 }
 0x2d5   : > { %p2760_p13 = scmp.lt.u32.totalorder %s2758_s20, %s2754_s18  ;;  %p2762_p2 = scmp.lt.u32.totalorder %s2754_s18, %s3426_s7 }
 0x2d6   : > { %p2756_p11 = pnand %p2755_p10, %p2959_p5 }
 0x2d7   : > { %p2761_p1 = por %p2760_p13, %p2759_p0 }
 0x2d8   : > { %p2757_p12 = pneg %p2756_p11 }
 0x2d9   : > { %p2763_p3 = por %p2762_p2, %p2761_p1 }
 0x2db   : > { %p2764_p4 = pnand %p2763_p3, %p2757_p12 }
 0x2dd   : > { %2767 = shalt.err (!%p2764_p4)
}
 0x2de   : > { %s2841_s6 = smov 64   ;;  %s2842_s0 = smov 4  }
 0x2df   : > { %2594 = dma.vmem_to_hbm [thread:$0]  (%p2959_p5), %s3428_s26, 1024, %s3426_s7, %s1726_s5, %s2841_s6, %s2841_s6, %s2842_s0  }
 0x2e0   : > { %s3458_s17 = scalar_lea.vmem %s3554_s12, %s2974_s27  ;;  %s507_s27 = scalar_lea.vmem [#allocation6], %s3293_s1 }
 0x2e1   : > { %s1794_s26 = sshll.u32 %s507_s27, 4  ;;  %s3499_s18 = scalar_lea.hbm %s3556_s14, %s2970_s25  ;;  %s3493_s26 = int_to_ptr.vmem [resolvable:$true] %s1794_s26 }
 0x2e2   : > { %s2768_s21 = scalar_lea.vmem %s3493_s26, 16  ;;  %s2843_s1 = smov [#allocation6]  }
 0x2e3   : > { %p2769_p7 = scmp.ne.s32.totalorder %s3493_s26, %s2768_s21  ;;  %s2772_s22 = sshll.u32 %s2843_s1, 4  ;;  %s2773_s22 = int_to_ptr.vmem [resolvable:$false] %s2772_s22 }
 0x2e4   : > { %s2774_s20 = scalar_lea.vmem %s2773_s22, 32  ;;  %p2775_p10 = scmp.lt.s32.totalorder %s3493_s26, %s2773_s22 }
 0x2e5   : > { %p2770_p8 = pnand %p2769_p7, %p2959_p5  ;;  %p2776_p11 = scmp.lt.s32.totalorder %s2774_s20, %s2768_s21 }
 0x2e7   : > { %p2771_p9 = pneg %p2770_p8  ;;  %p2777_p12 = por %p2776_p11, %p2775_p10 }
 0x2e9   : > { %p2778_p0 = pnand %p2777_p12, %p2771_p9 }
 0x30f   : > { %v2382_v34 = vpop.f32.mrb[16].mxu1 }
 0x310   : > { %1486 = vst.msk [vmem:[%s3458_s17 + $0x8] sm:$0xff] %vm1307_vm2, %v2382_v34  ;;  %v1406_v36 = vpop.f32.mrb[17].mxu1 }
 0x311   : > { %1485 = vst.msk [vmem:[%s3458_s17] sm:$0xff] %vm1307_vm2, %v1406_v36 }
 0x313   : > { %v2385_v28 = vpop.f32.mrb[18].mxu1 }
 0x314   : > { %1488 = vst.msk [vmem:[%s3458_s17 + $0x18] sm:$0xff] %vm1307_vm2, %v2385_v28  ;;  %v1416_v23 = vpop.f32.mrb[19].mxu1 }
 0x315   : > { %1487 = vst.msk [vmem:[%s3458_s17 + $0x10] sm:$0xff] %vm1307_vm2, %v1416_v23 }
 0x317   : > { %v2388_v38 = vpop.f32.mrb[20].mxu1 }
 0x318   : > { %1490 = vst.msk [vmem:[%s3458_s17 + $0x28] sm:$0xff] %vm1307_vm2, %v2388_v38  ;;  %v1426_v39 = vpop.f32.mrb[21].mxu1 }
 0x319   : > { %1489 = vst.msk [vmem:[%s3458_s17 + $0x20] sm:$0xff] %vm1307_vm2, %v1426_v39 }
 0x31b   : > { %v2391_v32 = vpop.f32.mrb[22].mxu1 }
 0x31c   : > { %1492 = vst.msk [vmem:[%s3458_s17 + $0x38] sm:$0xff] %vm1307_vm2, %v2391_v32  ;;  %v1436_v40 = vpop.f32.mrb[23].mxu1 }
 0x31d   : > { %1491 = vst.msk [vmem:[%s3458_s17 + $0x30] sm:$0xff] %vm1307_vm2, %v1436_v40 }
 0x31f   : > { %v2394_v41 = vpop.f32.mrb[24].mxu1 }
 0x320   : > { %1494 = vst.msk [vmem:[%s3458_s17 + $0x48] sm:$0xff] %vm1307_vm2, %v2394_v41  ;;  %v1446_v43 = vpop.f32.mrb[25].mxu1 }
 0x321   : > { %1493 = vst.msk [vmem:[%s3458_s17 + $0x40] sm:$0xff] %vm1307_vm2, %v1446_v43 }
 0x323   : > { %v2397_v45 = vpop.f32.mrb[26].mxu1 }
 0x324   : > { %1496 = vst.msk [vmem:[%s3458_s17 + $0x58] sm:$0xff] %vm1307_vm2, %v2397_v45  ;;  %v1456_v35 = vpop.f32.mrb[27].mxu1 }
 0x325   : > { %1495 = vst.msk [vmem:[%s3458_s17 + $0x50] sm:$0xff] %vm1307_vm2, %v1456_v35 }
 0x327   : > { %v2400_v46 = vpop.f32.mrb[28].mxu1 }
 0x328   : > { %1498 = vst.msk [vmem:[%s3458_s17 + $0x68] sm:$0xff] %vm1307_vm2, %v2400_v46  ;;  %v1466_v47 = vpop.f32.mrb[29].mxu1 }
 0x329   : > { %1497 = vst.msk [vmem:[%s3458_s17 + $0x60] sm:$0xff] %vm1307_vm2, %v1466_v47 }
 0x32b   : > { %v2403_v29 = vpop.f32.mrb[30].mxu1 }
 0x32c   : > { %1500 = vst.msk [vmem:[%s3458_s17 + $0x78] sm:$0xff] %vm1307_vm2, %v2403_v29  ;;  %v1476_v48 = vpop.f32.mrb[31].mxu1 }
 0x32d   : > { %1499 = vst.msk [vmem:[%s3458_s17 + $0x70] sm:$0xff] %vm1307_vm2, %v1476_v48 }
 0x34f   : > { %v1640_v50 = vpop.f32.mrb[32].mxu1 }
 0x350   : > { %1644 = vst [vmem:[%s507_s27] sm:$0x1] %v1640_v50  ;;  %v2473_v51 = vpop.f32.mrb[33].mxu1 }
 0x351   : > { %2781 = shalt.err (!%p2778_p0)
}
 0x352   : > { %s2782_s25 = scalar_lea.hbm %s3499_s18, 16  ;;  %s2786_s6 = scalar_lea.hbm %s3556_s14, 32 }
 0x353   : > { %p2783_p13 = scmp.ne.s32.totalorder %s3499_s18, %s2782_s25  ;;  %p2787_p3 = scmp.lt.u32.totalorder %s3499_s18, %s3556_s14 }
 0x354   : > { %p2788_p4 = scmp.lt.u32.totalorder %s2786_s6, %s2782_s25  ;;  %p2790_p8 = scmp.lt.u32.totalorder %s2782_s25, %s3499_s18 }
 0x355   : > { %p2784_p1 = pnand %p2783_p13, %p2959_p5 }
 0x356   : > { %p2789_p7 = por %p2788_p4, %p2787_p3 }
 0x357   : > { %p2785_p2 = pneg %p2784_p1 }
 0x358   : > { %p2791_p9 = por %p2790_p8, %p2789_p7 }
 0x35a   : > { %p2792_p10 = pnand %p2791_p9, %p2785_p2 }
 0x35c   : > { %2795 = shalt.err (!%p2792_p10)
}
 0x35d   : > { %2596 = dma.vmem_to_hbm [thread:$0]  (%p2959_p5), %s3493_s26, 16, %s3499_s18, %s3402_s2  }
 0x35e PF: > { %p2610_p11 = scmp.ge.s32.totalorder %s2834_s16, 2  ;;  %s1806_s4 = sand.u32 1, %s2822_s29  }
 0x35f   : > { %s1807_s17 = scalar_lea.sflag [#allocation3], %s1806_s4 }
 0x360   : > { %p2601_p12 = pnand %p2610_p11, %p2963_p6 }
 0x362   : > { %2813 = dma.done.wait (!%p2601_p12), %s1807_s17, 1024  }
 0x363   : > { %2815 = vsyncadd (!%p2601_p12), %s1807_s17, 4294966272  ;;  %s3579_s27 = sadd.s32 4294967294, %s2834_s16  }
 0x364   : > { %s1831_s7 = sand.u32 1, %s3579_s27  }
 0x365   : > { %s1832_s5 = scalar_lea.sflag [#allocation5], %s1831_s7 }
 0x366   : > { %2817 = dma.done.wait (!%p2601_p12), %s1832_s5, 32  }
 0x367   : > { %2819 = vsyncadd (!%p2601_p12), %s1832_s5, 4294967264  ;;  %s3580_s23 = sld [smem:[#allocation9_spill]]  ;;  %s3581_s15 = sld [smem:[#allocation10_spill]] }
 0x368   : > { %p28_p5 = scmp.ge.s32.totalorder %s2944_s19, 4   ;;  %s3582_s29 = smov %s2826_s30 }
 0x369   : > { %s3584_s16 = smov %s2944_s19 }
 0x36a   :  { %30 = sbr.rel (!%p28_p5) target bundleno = 14 (0xe), region = 154 }
 0x36d   : > { %s3583_s30 = smov %s3580_s23 }
 0x371   :  { %1844 = vsyncpa [#allocation3], 1 }
 0x372   :  { %1846 = vsyncpa [#allocation3 + $0x1], 1 }
 0x373   :  { %1847 = vsyncpa [#allocation5], 1 }
 0x374   :  { %1849 = vsyncpa [#allocation5 + $0x1], 1 }

</bundles_post_ra>
